<compile_context>
chip_gen: v6e
topology: v6e:2x2x1
jax: 0.10.0
libtpu: 0.0.40
codegen_flags: <defaults>
</compile_context>

<pallas_src>
import numpy as np
import jax
import jax.numpy as jnp
from jax.experimental import pallas as pl
from jax.experimental.pallas import tpu as pltpu


def _bottleneck_kernel(x_ref, w1_ref, s1_ref, b1_ref, w2_ref, s2_ref, b2_ref,
                       w3_ref, s3_ref, b3_ref, smat_ref, o_ref):
    x = x_ref[0]                                    # (Cin, HW) f32
    xb = x.astype(jnp.bfloat16)

    # conv1 (1x1) + bn1 + relu -> (P, HW); computed only on real pixels (no halo).
    h1 = jnp.dot(w1_ref[...], xb, preferred_element_type=jnp.float32)
    h1 = jnp.maximum(h1 * s1_ref[...] + b1_ref[...], 0.0)
    h1b = h1.astype(jnp.bfloat16)

    # conv2 (3x3, stride=1, pad=1):
    #   stage 1: per-tap channel mixing (9 tiny MXU dots)
    #   stage 2: ONE big matmul against the constant shift / zero-pad matrix S,
    #            which realizes the 9 spatial shifts + boundary zeros without
    #            any strided slice / reshape layout copies.
    taps = [jnp.dot(w2_ref[t], h1b, preferred_element_type=jnp.float32)
            for t in range(9)]                      # 9 x (P, HW)
    tcat = jnp.concatenate(taps, axis=1).astype(jnp.bfloat16)     # (P, 9*HW)
    h2 = jnp.dot(tcat, smat_ref[...], preferred_element_type=jnp.float32)
    h2 = jnp.maximum(h2 * s2_ref[...] + b2_ref[...], 0.0)         # (P, HW)

    # conv3 (1x1) + bn3 + residual add + relu -> (Cout, HW), lane-dense store.
    h3 = jnp.dot(w3_ref[...], h2.astype(jnp.bfloat16),
                 preferred_element_type=jnp.float32)
    h3 = h3 * s3_ref[...] + b3_ref[...]
    o_ref[0] = jnp.maximum(h3 + x, 0.0)


def _conv2_shift_matrix(H, W):
    """Constant (9*H*W, H*W) 0/1 matrix.

    Row t*HW + i, column j is 1 iff input pixel i is the (dy, dx) = (t//3, t%3)
    tap of output pixel j for a 3x3 conv with padding=1 (taps falling outside
    the image simply have no entry => zero padding)."""
    HW = H * W
    S = np.zeros((9, HW, HW), np.float32)
    for dy in range(3):
        for dx in range(3):
            t = dy * 3 + dx
            for oy in range(H):
                iy = oy + dy - 1
                if not (0 <= iy < H):
                    continue
                for ox in range(W):
                    ix = ox + dx - 1
                    if 0 <= ix < W:
                        S[t, iy * W + ix, oy * W + ox] = 1.0
    return S.reshape(9 * HW, HW)


def bottleneck_pallas(x_nchw, params):
    w1, s1, b1, w2, s2, b2, w3, s3, b3 = params
    N, Cin, H, W = x_nchw.shape
    P = w1.shape[1]
    Cout = w3.shape[1]
    HW = H * W
    if Cin != Cout:
        raise ValueError(
            "downsample=None requires inplanes == planes * expansion "
            f"(got Cin={Cin}, Cout={Cout})")

    # NCHW -> (N, C, H*W): free reshape, no transpose / pad HBM round trips.
    x = x_nchw.reshape(N, Cin, HW)

    # Kernel-layout parameters: matmul-LHS orientation, bf16 for the MXU,
    # per-channel BN scale/bias as (C, 1) columns (broadcast over lanes).
    w1k = w1.T.astype(jnp.bfloat16)                                   # (P, Cin)
    w2k = jnp.transpose(w2, (0, 1, 3, 2)).reshape(9, P, P).astype(jnp.bfloat16)
    w3k = w3.T.astype(jnp.bfloat16)                                   # (Cout, P)
    s1k, b1k = s1.reshape(P, 1), b1.reshape(P, 1)
    s2k, b2k = s2.reshape(P, 1), b2.reshape(P, 1)
    s3k, b3k = s3.reshape(Cout, 1), b3.reshape(Cout, 1)
    smat = jnp.asarray(_conv2_shift_matrix(H, W), dtype=jnp.bfloat16)  # (9*HW, HW)

    def _full(a):
        nd = a.ndim
        return pl.BlockSpec(a.shape, lambda n, _nd=nd: (0,) * _nd)

    out = pl.pallas_call(
        _bottleneck_kernel,
        out_shape=jax.ShapeDtypeStruct((N, Cout, HW), jnp.float32),
        grid=(N,),
        in_specs=[
            pl.BlockSpec((1, Cin, HW), lambda n: (n, 0, 0)),
            _full(w1k), _full(s1k), _full(b1k),
            _full(w2k), _full(s2k), _full(b2k),
            _full(w3k), _full(s3k), _full(b3k),
            _full(smat),
        ],
        out_specs=pl.BlockSpec((1, Cout, HW), lambda n: (n, 0, 0)),
        compiler_params=pltpu.CompilerParams(
            dimension_semantics=("parallel",),
            vmem_limit_bytes=32 * 1024 * 1024),
    )(x, w1k, s1k, b1k, w2k, s2k, b2k, w3k, s3k, b3k, smat)

    # (N, Cout, H*W) -> NCHW: free reshape.
    return out.reshape(N, Cout, H, W)


def _fold_bn(gamma, beta, mean, var, eps=1e-5):
    scale = gamma / jnp.sqrt(var + eps)
    bias = beta - mean * scale
    return scale.reshape(1, -1), bias.reshape(1, -1)


def make_params(key, inplanes, planes, expansion=4):
    cout = planes * expansion
    keys = jax.random.split(key, 15)
    # Weights stored in matmul-friendly layouts: (in, out) for 1x1 convs and
    # (kh, kw, in, out) (HWIO) for the 3x3 conv.
    w1 = 0.1 * jax.random.normal(keys[0], (inplanes, planes), jnp.float32)
    w2 = 0.1 * jax.random.normal(keys[1], (3, 3, planes, planes), jnp.float32)
    w3 = 0.1 * jax.random.normal(keys[2], (planes, cout), jnp.float32)

    def bn(kg, kb, km, kv, c):
        gamma = 1.0 + 0.1 * jax.random.normal(kg, (c,), jnp.float32)
        beta = 0.1 * jax.random.normal(kb, (c,), jnp.float32)
        mean = 0.1 * jax.random.normal(km, (c,), jnp.float32)
        var = 1.0 + 0.1 * jnp.abs(jax.random.normal(kv, (c,), jnp.float32))
        return _fold_bn(gamma, beta, mean, var)

    s1, b1 = bn(keys[3], keys[4], keys[5], keys[6], planes)
    s2, b2 = bn(keys[7], keys[8], keys[9], keys[10], planes)
    s3, b3 = bn(keys[11], keys[12], keys[13], keys[14], cout)
    return (w1, s1, b1, w2, s2, b2, w3, s3, b3)


def bottleneck_ref(x_nchw, params):
    """Pure-JAX reference (XLA convs, f32) for correctness checking."""
    w1, s1, b1, w2, s2, b2, w3, s3, b3 = params
    x = jnp.transpose(x_nchw, (0, 2, 3, 1))
    dn = ('NHWC', 'HWIO', 'NHWC')
    y = jax.lax.conv_general_dilated(x, w1.reshape(1, 1, *w1.shape), (1, 1),
                                     'VALID', dimension_numbers=dn)
    y = jnp.maximum(y * s1.reshape(1, 1, 1, -1) + b1.reshape(1, 1, 1, -1), 0.0)
    y = jax.lax.conv_general_dilated(y, w2, (1, 1), 'SAME',
                                     dimension_numbers=dn)
    y = jnp.maximum(y * s2.reshape(1, 1, 1, -1) + b2.reshape(1, 1, 1, -1), 0.0)
    y = jax.lax.conv_general_dilated(y, w3.reshape(1, 1, *w3.shape), (1, 1),
                                     'VALID', dimension_numbers=dn)
    y = y * s3.reshape(1, 1, 1, -1) + b3.reshape(1, 1, 1, -1)
    y = jnp.maximum(y + x, 0.0)
    return jnp.transpose(y, (0, 3, 1, 2))


if __name__ == "__main__":
    key = jax.random.PRNGKey(0)
    kx, kp = jax.random.split(key)

    # inplanes == planes * expansion and stride == 1 => downsample is None.
    N, inplanes, H, W = 4, 16, 16, 16
    planes = 4

    x = jax.random.normal(kx, (N, inplanes, H, W), jnp.float32)   # NCHW input
    params = make_params(kp, inplanes, planes)

    out = jax.block_until_ready(bottleneck_pallas(x, params))

    ref = bottleneck_ref(x, params)
    assert out.shape == (N, planes * 4, H, W)
    max_err = float(jnp.max(jnp.abs(out - ref)))
    # bf16 MXU inputs with f32 accumulation => slightly looser tolerance than pure f32.
    if max_err > 5e-2:
        raise SystemExit("mismatch vs reference: max abs err = %e" % max_err)
    print("KERNEL_OK")
</pallas_src>

<mosaic_0001>
module attributes {stable_mosaic.version = 11 : i64} {
  func.func @_bottleneck_kernel(%arg0: i32, %arg1: memref<1x16x256xf32, #tpu.memory_space<vmem>>, %arg2: memref<4x16xbf16, #tpu.memory_space<vmem>>, %arg3: memref<4x1xf32, #tpu.memory_space<vmem>>, %arg4: memref<4x1xf32, #tpu.memory_space<vmem>>, %arg5: memref<9x4x4xbf16, #tpu.memory_space<vmem>>, %arg6: memref<4x1xf32, #tpu.memory_space<vmem>>, %arg7: memref<4x1xf32, #tpu.memory_space<vmem>>, %arg8: memref<16x4xbf16, #tpu.memory_space<vmem>>, %arg9: memref<16x1xf32, #tpu.memory_space<vmem>>, %arg10: memref<16x1xf32, #tpu.memory_space<vmem>>, %arg11: memref<2304x256xbf16, #tpu.memory_space<vmem>>, %arg12: memref<1x16x256xf32, #tpu.memory_space<vmem>>) attributes {dimension_semantics = [#tpu.dimension_semantics<parallel>], iteration_bounds = array<i64: 4>, scalar_prefetch = 0 : i64, scratch_operands = 0 : i64, tpu.core_type = #tpu.core_type<tc>, window_params = [{transform_indices = @transform_0, window_bounds = array<i64: 1, 16, 256>}, {pipeline_mode = #tpu.pipeline_mode<synchronous>, transform_indices = @transform_1, window_bounds = array<i64: 4, 16>}, {pipeline_mode = #tpu.pipeline_mode<synchronous>, transform_indices = @transform_2, window_bounds = array<i64: 4, 1>}, {pipeline_mode = #tpu.pipeline_mode<synchronous>, transform_indices = @transform_3, window_bounds = array<i64: 4, 1>}, {pipeline_mode = #tpu.pipeline_mode<synchronous>, transform_indices = @transform_4, window_bounds = array<i64: 9, 4, 4>}, {pipeline_mode = #tpu.pipeline_mode<synchronous>, transform_indices = @transform_5, window_bounds = array<i64: 4, 1>}, {pipeline_mode = #tpu.pipeline_mode<synchronous>, transform_indices = @transform_6, window_bounds = array<i64: 4, 1>}, {pipeline_mode = #tpu.pipeline_mode<synchronous>, transform_indices = @transform_7, window_bounds = array<i64: 16, 4>}, {pipeline_mode = #tpu.pipeline_mode<synchronous>, transform_indices = @transform_8, window_bounds = array<i64: 16, 1>}, {pipeline_mode = #tpu.pipeline_mode<synchronous>, transform_indices = @transform_9, window_bounds = array<i64: 16, 1>}, {pipeline_mode = #tpu.pipeline_mode<synchronous>, transform_indices = @transform_10, window_bounds = array<i64: 2304, 256>}, {transform_indices = @transform_11, window_bounds = array<i64: 1, 16, 256>}]} {
    %c0 = arith.constant 0 : index
    %c0_0 = arith.constant 0 : index
    %c0_1 = arith.constant 0 : index
    %0 = vector.load %arg1[%c0, %c0_0, %c0_1] : memref<1x16x256xf32, #tpu.memory_space<vmem>>, vector<1x16x256xf32>
    %1 = vector.shape_cast %0 : vector<1x16x256xf32> to vector<16x256xf32>
    %2 = arith.truncf %1 : vector<16x256xf32> to vector<16x256xbf16>
    %c0_2 = arith.constant 0 : index
    %c0_3 = arith.constant 0 : index
    %3 = vector.load %arg2[%c0_2, %c0_3] : memref<4x16xbf16, #tpu.memory_space<vmem>>, vector<4x16xbf16>
    %cst = arith.constant dense<0.000000e+00> : vector<4x256xf32>
    %4 = tpu.matmul %3, %2, %cst {dimension_numbers = #tpu.dot_dimension_numbers<[1], [0], [0], [1], [0, 0, 1, 1], [], []>} : vector<4x16xbf16>, vector<16x256xbf16>, vector<4x256xf32> -> vector<4x256xf32>
    %c0_4 = arith.constant 0 : index
    %c0_5 = arith.constant 0 : index
    %5 = vector.load %arg3[%c0_4, %c0_5] : memref<4x1xf32, #tpu.memory_space<vmem>>, vector<4x1xf32>
    %6 = vector.broadcast %5 : vector<4x1xf32> to vector<4x256xf32>
    %7 = arith.mulf %4, %6 : vector<4x256xf32>
    %c0_6 = arith.constant 0 : index
    %c0_7 = arith.constant 0 : index
    %8 = vector.load %arg4[%c0_6, %c0_7] : memref<4x1xf32, #tpu.memory_space<vmem>>, vector<4x1xf32>
    %9 = vector.broadcast %8 : vector<4x1xf32> to vector<4x256xf32>
    %10 = arith.addf %7, %9 : vector<4x256xf32>
    %cst_8 = arith.constant 0.000000e+00 : f32
    %11 = vector.broadcast %cst_8 : f32 to vector<4x256xf32>
    %12 = arith.maximumf %10, %11 : vector<4x256xf32>
    %13 = arith.truncf %12 : vector<4x256xf32> to vector<4x256xbf16>
    %c0_9 = arith.constant 0 : index
    %c0_10 = arith.constant 0 : index
    %c0_11 = arith.constant 0 : index
    %14 = vector.load %arg5[%c0_9, %c0_10, %c0_11] : memref<9x4x4xbf16, #tpu.memory_space<vmem>>, vector<1x4x4xbf16>
    %15 = vector.shape_cast %14 : vector<1x4x4xbf16> to vector<4x4xbf16>
    %cst_12 = arith.constant dense<0.000000e+00> : vector<4x256xf32>
    %16 = tpu.matmul %15, %13, %cst_12 {dimension_numbers = #tpu.dot_dimension_numbers<[1], [0], [0], [1], [0, 0, 1, 1], [], []>} : vector<4x4xbf16>, vector<4x256xbf16>, vector<4x256xf32> -> vector<4x256xf32>
    %c1 = arith.constant 1 : index
    %c0_13 = arith.constant 0 : index
    %c0_14 = arith.constant 0 : index
    %17 = vector.load %arg5[%c1, %c0_13, %c0_14] : memref<9x4x4xbf16, #tpu.memory_space<vmem>>, vector<1x4x4xbf16>
    %18 = vector.shape_cast %17 : vector<1x4x4xbf16> to vector<4x4xbf16>
    %cst_15 = arith.constant dense<0.000000e+00> : vector<4x256xf32>
    %19 = tpu.matmul %18, %13, %cst_15 {dimension_numbers = #tpu.dot_dimension_numbers<[1], [0], [0], [1], [0, 0, 1, 1], [], []>} : vector<4x4xbf16>, vector<4x256xbf16>, vector<4x256xf32> -> vector<4x256xf32>
    %c2 = arith.constant 2 : index
    %c0_16 = arith.constant 0 : index
    %c0_17 = arith.constant 0 : index
    %20 = vector.load %arg5[%c2, %c0_16, %c0_17] : memref<9x4x4xbf16, #tpu.memory_space<vmem>>, vector<1x4x4xbf16>
    %21 = vector.shape_cast %20 : vector<1x4x4xbf16> to vector<4x4xbf16>
    %cst_18 = arith.constant dense<0.000000e+00> : vector<4x256xf32>
    %22 = tpu.matmul %21, %13, %cst_18 {dimension_numbers = #tpu.dot_dimension_numbers<[1], [0], [0], [1], [0, 0, 1, 1], [], []>} : vector<4x4xbf16>, vector<4x256xbf16>, vector<4x256xf32> -> vector<4x256xf32>
    %c3 = arith.constant 3 : index
    %c0_19 = arith.constant 0 : index
    %c0_20 = arith.constant 0 : index
    %23 = vector.load %arg5[%c3, %c0_19, %c0_20] : memref<9x4x4xbf16, #tpu.memory_space<vmem>>, vector<1x4x4xbf16>
    %24 = vector.shape_cast %23 : vector<1x4x4xbf16> to vector<4x4xbf16>
    %cst_21 = arith.constant dense<0.000000e+00> : vector<4x256xf32>
    %25 = tpu.matmul %24, %13, %cst_21 {dimension_numbers = #tpu.dot_dimension_numbers<[1], [0], [0], [1], [0, 0, 1, 1], [], []>} : vector<4x4xbf16>, vector<4x256xbf16>, vector<4x256xf32> -> vector<4x256xf32>
    %c4 = arith.constant 4 : index
    %c0_22 = arith.constant 0 : index
    %c0_23 = arith.constant 0 : index
    %26 = vector.load %arg5[%c4, %c0_22, %c0_23] : memref<9x4x4xbf16, #tpu.memory_space<vmem>>, vector<1x4x4xbf16>
    %27 = vector.shape_cast %26 : vector<1x4x4xbf16> to vector<4x4xbf16>
    %cst_24 = arith.constant dense<0.000000e+00> : vector<4x256xf32>
    %28 = tpu.matmul %27, %13, %cst_24 {dimension_numbers = #tpu.dot_dimension_numbers<[1], [0], [0], [1], [0, 0, 1, 1], [], []>} : vector<4x4xbf16>, vector<4x256xbf16>, vector<4x256xf32> -> vector<4x256xf32>
    %c5 = arith.constant 5 : index
    %c0_25 = arith.constant 0 : index
    %c0_26 = arith.constant 0 : index
    %29 = vector.load %arg5[%c5, %c0_25, %c0_26] : memref<9x4x4xbf16, #tpu.memory_space<vmem>>, vector<1x4x4xbf16>
    %30 = vector.shape_cast %29 : vector<1x4x4xbf16> to vector<4x4xbf16>
    %cst_27 = arith.constant dense<0.000000e+00> : vector<4x256xf32>
    %31 = tpu.matmul %30, %13, %cst_27 {dimension_numbers = #tpu.dot_dimension_numbers<[1], [0], [0], [1], [0, 0, 1, 1], [], []>} : vector<4x4xbf16>, vector<4x256xbf16>, vector<4x256xf32> -> vector<4x256xf32>
    %c6 = arith.constant 6 : index
    %c0_28 = arith.constant 0 : index
    %c0_29 = arith.constant 0 : index
    %32 = vector.load %arg5[%c6, %c0_28, %c0_29] : memref<9x4x4xbf16, #tpu.memory_space<vmem>>, vector<1x4x4xbf16>
    %33 = vector.shape_cast %32 : vector<1x4x4xbf16> to vector<4x4xbf16>
    %cst_30 = arith.constant dense<0.000000e+00> : vector<4x256xf32>
    %34 = tpu.matmul %33, %13, %cst_30 {dimension_numbers = #tpu.dot_dimension_numbers<[1], [0], [0], [1], [0, 0, 1, 1], [], []>} : vector<4x4xbf16>, vector<4x256xbf16>, vector<4x256xf32> -> vector<4x256xf32>
    %c7 = arith.constant 7 : index
    %c0_31 = arith.constant 0 : index
    %c0_32 = arith.constant 0 : index
    %35 = vector.load %arg5[%c7, %c0_31, %c0_32] : memref<9x4x4xbf16, #tpu.memory_space<vmem>>, vector<1x4x4xbf16>
    %36 = vector.shape_cast %35 : vector<1x4x4xbf16> to vector<4x4xbf16>
    %cst_33 = arith.constant dense<0.000000e+00> : vector<4x256xf32>
    %37 = tpu.matmul %36, %13, %cst_33 {dimension_numbers = #tpu.dot_dimension_numbers<[1], [0], [0], [1], [0, 0, 1, 1], [], []>} : vector<4x4xbf16>, vector<4x256xbf16>, vector<4x256xf32> -> vector<4x256xf32>
    %c8 = arith.constant 8 : index
    %c0_34 = arith.constant 0 : index
    %c0_35 = arith.constant 0 : index
    %38 = vector.load %arg5[%c8, %c0_34, %c0_35] : memref<9x4x4xbf16, #tpu.memory_space<vmem>>, vector<1x4x4xbf16>
    %39 = vector.shape_cast %38 : vector<1x4x4xbf16> to vector<4x4xbf16>
    %cst_36 = arith.constant dense<0.000000e+00> : vector<4x256xf32>
    %40 = tpu.matmul %39, %13, %cst_36 {dimension_numbers = #tpu.dot_dimension_numbers<[1], [0], [0], [1], [0, 0, 1, 1], [], []>} : vector<4x4xbf16>, vector<4x256xbf16>, vector<4x256xf32> -> vector<4x256xf32>
    %41 = tpu.concatenate %16, %19, %22, %25, %28, %31, %34, %37, %40 in 1 : vector<4x256xf32>, vector<4x256xf32>, vector<4x256xf32>, vector<4x256xf32>, vector<4x256xf32>, vector<4x256xf32>, vector<4x256xf32>, vector<4x256xf32>, vector<4x256xf32> -> vector<4x2304xf32>
    %42 = arith.truncf %41 : vector<4x2304xf32> to vector<4x2304xbf16>
    %c0_37 = arith.constant 0 : index
    %c0_38 = arith.constant 0 : index
    %43 = vector.load %arg11[%c0_37, %c0_38] : memref<2304x256xbf16, #tpu.memory_space<vmem>>, vector<2304x256xbf16>
    %cst_39 = arith.constant dense<0.000000e+00> : vector<4x256xf32>
    %44 = tpu.matmul %42, %43, %cst_39 {dimension_numbers = #tpu.dot_dimension_numbers<[1], [0], [0], [1], [0, 0, 1, 1], [], []>} : vector<4x2304xbf16>, vector<2304x256xbf16>, vector<4x256xf32> -> vector<4x256xf32>
    %c0_40 = arith.constant 0 : index
    %c0_41 = arith.constant 0 : index
    %45 = vector.load %arg6[%c0_40, %c0_41] : memref<4x1xf32, #tpu.memory_space<vmem>>, vector<4x1xf32>
    %46 = vector.broadcast %45 : vector<4x1xf32> to vector<4x256xf32>
    %47 = arith.mulf %44, %46 : vector<4x256xf32>
    %c0_42 = arith.constant 0 : index
    %c0_43 = arith.constant 0 : index
    %48 = vector.load %arg7[%c0_42, %c0_43] : memref<4x1xf32, #tpu.memory_space<vmem>>, vector<4x1xf32>
    %49 = vector.broadcast %48 : vector<4x1xf32> to vector<4x256xf32>
    %50 = arith.addf %47, %49 : vector<4x256xf32>
    %cst_44 = arith.constant 0.000000e+00 : f32
    %51 = vector.broadcast %cst_44 : f32 to vector<4x256xf32>
    %52 = arith.maximumf %50, %51 : vector<4x256xf32>
    %c0_45 = arith.constant 0 : index
    %c0_46 = arith.constant 0 : index
    %53 = vector.load %arg8[%c0_45, %c0_46] : memref<16x4xbf16, #tpu.memory_space<vmem>>, vector<16x4xbf16>
    %54 = arith.truncf %52 : vector<4x256xf32> to vector<4x256xbf16>
    %cst_47 = arith.constant dense<0.000000e+00> : vector<16x256xf32>
    %55 = tpu.matmul %53, %54, %cst_47 {dimension_numbers = #tpu.dot_dimension_numbers<[1], [0], [0], [1], [0, 0, 1, 1], [], []>} : vector<16x4xbf16>, vector<4x256xbf16>, vector<16x256xf32> -> vector<16x256xf32>
    %c0_48 = arith.constant 0 : index
    %c0_49 = arith.constant 0 : index
    %56 = vector.load %arg9[%c0_48, %c0_49] : memref<16x1xf32, #tpu.memory_space<vmem>>, vector<16x1xf32>
    %57 = vector.broadcast %56 : vector<16x1xf32> to vector<16x256xf32>
    %58 = arith.mulf %55, %57 : vector<16x256xf32>
    %c0_50 = arith.constant 0 : index
    %c0_51 = arith.constant 0 : index
    %59 = vector.load %arg10[%c0_50, %c0_51] : memref<16x1xf32, #tpu.memory_space<vmem>>, vector<16x1xf32>
    %60 = vector.broadcast %59 : vector<16x1xf32> to vector<16x256xf32>
    %61 = arith.addf %58, %60 : vector<16x256xf32>
    %62 = arith.addf %61, %1 : vector<16x256xf32>
    %cst_52 = arith.constant 0.000000e+00 : f32
    %63 = vector.broadcast %cst_52 : f32 to vector<16x256xf32>
    %64 = arith.maximumf %62, %63 : vector<16x256xf32>
    %c0_53 = arith.constant 0 : index
    %c0_54 = arith.constant 0 : index
    %c0_55 = arith.constant 0 : index
    %65 = vector.load %arg12[%c0_53, %c0_54, %c0_55] : memref<1x16x256xf32, #tpu.memory_space<vmem>>, vector<1x16x256xf32>
    %66 = vector.shape_cast %65 : vector<1x16x256xf32> to vector<16x256xf32>
    %67 = vector.shape_cast %64 : vector<16x256xf32> to vector<1x16x256xf32>
    tpu.vector_store %arg12[%c0_53, %c0_54, %c0_55], %67 {strides = array<i32>} : memref<1x16x256xf32, #tpu.memory_space<vmem>>, vector<1x16x256xf32>,
    return
  }
  func.func @transform_0(%arg0: i32) -> (i32, i32, i32) {
    %c0_i32 = arith.constant 0 : i32
    %c0_i32_0 = arith.constant 0 : i32
    %c0_i32_1 = arith.constant 0 : i32
    return %arg0, %c0_i32, %c0_i32_0 : i32, i32, i32
  }
  func.func @transform_1(%arg0: i32) -> (i32, i32) {
    %c0_i32 = arith.constant 0 : i32
    %c0_i32_0 = arith.constant 0 : i32
    %c0_i32_1 = arith.constant 0 : i32
    return %c0_i32, %c0_i32_0 : i32, i32
  }
  func.func @transform_2(%arg0: i32) -> (i32, i32) {
    %c0_i32 = arith.constant 0 : i32
    %c0_i32_0 = arith.constant 0 : i32
    %c0_i32_1 = arith.constant 0 : i32
    return %c0_i32, %c0_i32_0 : i32, i32
  }
  func.func @transform_3(%arg0: i32) -> (i32, i32) {
    %c0_i32 = arith.constant 0 : i32
    %c0_i32_0 = arith.constant 0 : i32
    %c0_i32_1 = arith.constant 0 : i32
    return %c0_i32, %c0_i32_0 : i32, i32
  }
  func.func @transform_4(%arg0: i32) -> (i32, i32, i32) {
    %c0_i32 = arith.constant 0 : i32
    %c0_i32_0 = arith.constant 0 : i32
    %c0_i32_1 = arith.constant 0 : i32
    %c0_i32_2 = arith.constant 0 : i32
    return %c0_i32, %c0_i32_0, %c0_i32_1 : i32, i32, i32
  }
  func.func @transform_5(%arg0: i32) -> (i32, i32) {
    %c0_i32 = arith.constant 0 : i32
    %c0_i32_0 = arith.constant 0 : i32
    %c0_i32_1 = arith.constant 0 : i32
    return %c0_i32, %c0_i32_0 : i32, i32
  }
  func.func @transform_6(%arg0: i32) -> (i32, i32) {
    %c0_i32 = arith.constant 0 : i32
    %c0_i32_0 = arith.constant 0 : i32
    %c0_i32_1 = arith.constant 0 : i32
    return %c0_i32, %c0_i32_0 : i32, i32
  }
  func.func @transform_7(%arg0: i32) -> (i32, i32) {
    %c0_i32 = arith.constant 0 : i32
    %c0_i32_0 = arith.constant 0 : i32
    %c0_i32_1 = arith.constant 0 : i32
    return %c0_i32, %c0_i32_0 : i32, i32
  }
  func.func @transform_8(%arg0: i32) -> (i32, i32) {
    %c0_i32 = arith.constant 0 : i32
    %c0_i32_0 = arith.constant 0 : i32
    %c0_i32_1 = arith.constant 0 : i32
    return %c0_i32, %c0_i32_0 : i32, i32
  }
  func.func @transform_9(%arg0: i32) -> (i32, i32) {
    %c0_i32 = arith.constant 0 : i32
    %c0_i32_0 = arith.constant 0 : i32
    %c0_i32_1 = arith.constant 0 : i32
    return %c0_i32, %c0_i32_0 : i32, i32
  }
  func.func @transform_10(%arg0: i32) -> (i32, i32) {
    %c0_i32 = arith.constant 0 : i32
    %c0_i32_0 = arith.constant 0 : i32
    %c0_i32_1 = arith.constant 0 : i32
    return %c0_i32, %c0_i32_0 : i32, i32
  }
  func.func @transform_11(%arg0: i32) -> (i32, i32, i32) {
    %c0_i32 = arith.constant 0 : i32
    %c0_i32_0 = arith.constant 0 : i32
    %c0_i32_1 = arith.constant 0 : i32
    return %arg0, %c0_i32, %c0_i32_0 : i32, i32, i32
  }
}

</mosaic_0001>

<bundles_post_ra>
// kernel: tpu_custom_call.1
= control target key start
LH: loop header
LB: loop body
LE: loop exit
PB: predicated region body
PF: predicated region fallthrough
CT: control target
= control target key end

     0   :  { %s4705_s0 = inlined_call_operand.hbm [shape: f32[4,16,256], index: 0, kind: input, shape index: {}]   ;;  %s4706_s1 = inlined_call_operand.hbm [shape: bf16[4,16], index: 1, kind: input, shape index: {}]   ;;  %s4707_s2 = inlined_call_operand.vmem [shape: f32[4,1], index: 2, kind: input, shape index: {}]   ;;  %s4708_s3 = inlined_call_operand.vmem [shape: f32[4,1], index: 3, kind: input, shape index: {}]   ;;  %s4709_s4 = inlined_call_operand.vmem [shape: bf16[9,4,4], index: 4, kind: input, shape index: {}]   ;;  %s4710_s5 = inlined_call_operand.vmem [shape: f32[4,1], index: 5, kind: input, shape index: {}]   ;;  %s4711_s6 = inlined_call_operand.vmem [shape: f32[4,1], index: 6, kind: input, shape index: {}]   ;;  %s4712_s7 = inlined_call_operand.vmem [shape: bf16[16,4], index: 7, kind: input, shape index: {}]   ;;  %s4713_s8 = inlined_call_operand.vmem [shape: f32[16,1], index: 8, kind: input, shape index: {}]   ;;  %s4714_s9 = inlined_call_operand.vmem [shape: f32[16,1], index: 9, kind: input, shape index: {}]   ;;  %s4715_s10 = inlined_call_operand.hbm [shape: bf16[2304,256], index: 10, kind: input, shape index: {}]   ;;  %s4716_s11 = inlined_call_operand.hbm [shape: f32[4,16,256], index: 11, kind: output, shape index: {}]  }
   0x1   :  { %4729 = sst [smem:[#allocation18_spill]] %s4706_s1 }
   0x2   :  { %4730 = sst [smem:[#allocation19_spill]] %s4716_s11 }
   0x3   :  { %16 = vsyncpa [#allocation3], 0 }
   0x4   :  { %18 = vsyncpa [#allocation3 + $0x1], 0 }
   0x5   :  { %19 = vsyncpa [#allocation6], 0 }
   0x6   :  { %20 = vsyncpa [#allocation4], 0 }
   0x7   :  { %22 = vsyncpa [#allocation4 + $0x1], 0  ;;  %s4342_s17 = smov 0   ;;  %s4344_s18 = smov 0  }
   0x8   :  { %s4346_s19 = smov 0   ;;  %s4348_s20 = smov 0  }
   0x9 LB: > { %4731 = sst [smem:[#allocation12_spill]] %s4257_s17  ;;  %s4363_s21 = sadd.s32 4294967295, %s4269_s20   ;;  %s4269_s20 = sphi %s4348_s20, %s4755_s20   ;;  %s4265_s19 = sphi %s4346_s19, %s4760_s19   ;;  %s4261_s18 = sphi %s4344_s18, %s4759_s18   ;;  %s4257_s17 = sphi %s4342_s17, %s4758_s17  }
   0xa   : > { %4732 = sst [smem:[#allocation13_spill]] %s4265_s19  ;;  %s3270_s22 = sadd.s32 4294967294, %s4269_s20  }
   0xb   : > { %s4367_s23 = sadd.s32 1, %s4269_s20   ;;  %s35_s24 = sadd.s32 1, %s4265_s19 }
   0xc   : > { %4733 = sst [smem:[#allocation14_spill]] %s4367_s23  ;;  %s32_s25 = ssub.s32 %s4269_s20, %s4367_s23 }
   0xd   : > { %p42_p0 = scmp.ne.s32.totalorder %s4265_s19, %s4261_s18  ;;  %p33_p1 = scmp.eq.s32.totalorder %s32_s25, 0 }
   0xe   : > { %p43_p2 = scmp.eq.s32.totalorder %s4269_s20, 0  ;;  %p48_p3 = scmp.ne.s32.totalorder %s4261_s18, %s4257_s17 }
   0xf   : > { %p4717_p4 = scmp.eq.s32.totalorder %s4363_s21, 0  ;;  %p282_p7 = scmp.eq.s32.totalorder %s4363_s21, 3 }
  0x10   : > { %s4379_s26 = scalar_select %p33_p1, %s4265_s19, %s35_s24  }
  0x11   : > { %p4381_p5 = por %p43_p2, %p42_p0  ;;  %p4387_p6 = por %p4717_p4, %p48_p3 }
  0x12   : > { %4734 = sst [smem:[#allocation15_spill]] %s4379_s26  ;;  %p288_p8 = scmp.eq.s32.totalorder %s3270_s22, 3 }
  0x13   : > { %s4736_s28 = scalar_select %p4387_p6, 1, 0 }
  0x14   : > { %p3271_p9 = scmp.ge.s32.totalorder %s4269_s20, 1  ;;  %p295_p10 = scmp.lt.s32.totalorder %s4269_s20, 5 }
  0x15   : > { %p4394_p11 = por %p282_p7, %p42_p0  ;;  %p4398_p12 = por %p288_p8, %p48_p3 }
  0x16   : > { %p4402_p13 = pnand %p3271_p9, %p295_p10  ;;  %s4271_s13 = smov [#allocation5]  }
  0x17   : > { %s4737_s29 = scalar_select %p4394_p11, 1, 0 }
  0x18   : > { %s4739_s30 = scalar_select %p4398_p12, 1, 0 }
  0x19   : > { %4738 = sst [smem:[#allocation16_spill]] %s4737_s29  ;;  %p3620_p1 = pneg %p4402_p13 }
  0x1a   : > { %4740 = sst [smem:[#allocation17_spill]] %s4739_s30  ;;  %s308_s14 = sshll.u32 %s4271_s13, 4  ;;  %s309_s14 = int_to_ptr.vmem [resolvable:$true] %s308_s14 }
  0x1b   : > { %s4741_s12 = scalar_select %p4402_p13, 1, 0 }
  0x1c   : > { %p3637_p2 = scmp.lt.s32.totalorder %s4269_s20, 4  ;;  %p4411_p0 = pnand %p3620_p1, %p4717_p4 }
  0x1d   : > { %s4272_s22 = smov [#allocation7]   ;;  %s4132_s25 = scalar_lea.vmem %s309_s14, 32 }
  0x1e   : > { %p4417_p3 = pnand %p3637_p2, %p4381_p5  ;;  %s342_s24 = sshll.u32 %s4272_s22, 4  ;;  %s343_s24 = int_to_ptr.vmem [resolvable:$true] %s342_s24 }
  0x1f   : > { %p4123_p7 = pneg %p4411_p0  ;;  %p4133_p8 = scmp.ne.s32.totalorder %s309_s14, %s4132_s25 }
  0x20   : > { %p4140_p1 = scmp.lt.s32.totalorder %s309_s14, %s309_s14  ;;  %p4141_p4 = scmp.lt.s32.totalorder %s4132_s25, %s4132_s25 }
  0x21   : > { %p4135_p9 = pnand %p4133_p8, %p4123_p7 }
  0x22   : > { %p4142_p12 = por %p4141_p4, %p4140_p1 }
  0x23   : > { %p4136_p10 = pneg %p4135_p9 }
  0x25   : > { %p4143_p11 = pnand %p4142_p12, %p4136_p10 }
  0x27   : > { %4146 = shalt.err (!%p4143_p11)
}
  0x28   : > { %s4744_s1 = sld [smem:[#allocation18_spill]]  ;;  %s356_s22 = sand.u32 1, %s4265_s19  }
  0x29   : > { %s4158_s26 = scalar_lea.vmem %s343_s24, 36864  ;;  %p4166_p9 = scmp.lt.s32.totalorder %s343_s24, %s343_s24 }
  0x2a   : > { %p4159_p5 = scmp.ne.s32.totalorder %s343_s24, %s4158_s26  ;;  %p4167_p6 = scmp.lt.s32.totalorder %s4158_s26, %s4158_s26 }
  0x2c   : > { %p4161_p2 = pnand %p4159_p5, %p4123_p7  ;;  %p4168_p4 = por %p4167_p6, %p4166_p9 }
  0x2e   : > { %3623 = dma.hbm_to_vmem [thread:$0]  (!%p4411_p0), %s4744_s1, 32, %s309_s14, [#allocation6]  }
  0x2f   : > { %p4162_p8 = pneg %p4161_p2 }
  0x31   : > { %p4169_p12 = pnand %p4168_p4, %p4162_p8 }
  0x33   : > { %4172 = shalt.err (!%p4169_p12)
}
  0x34   : > { %s4273_s25 = smov 128   ;;  %s4274_s27 = smov 8  }
  0x35   : > { %3626 = dma.hbm_to_vmem [thread:$0]  (!%p4411_p0), %s4715_s10, 36864, %s343_s24, [#allocation6], %s4273_s25, %s4273_s25, %s4274_s27  }
  0x36   : > { %s3275_s1 = sshll.u32 %s356_s22, 5  ;;  %s3606_s19 = sshll.u32 %s4269_s20, 9 }
  0x37   : > { %s4444_s17 = scalar_lea.hbm %s4705_s0, %s3606_s19  ;;  %s360_s26 = scalar_lea.vmem [#allocation2], %s3275_s1 }
  0x38   : > { %s367_s11 = sshll.u32 %s360_s26, 4  ;;  %s4448_s29 = scalar_lea.sflag [#allocation3], %s356_s22  ;;  %s4446_s11 = int_to_ptr.vmem [resolvable:$true] %s367_s11 }
  0x39   : > { %s4173_s15 = scalar_lea.hbm %s4444_s17, 512  ;;  %p4175_p11 = pneg %p4417_p3 }
  0x3a   : > { %p4174_p6 = scmp.ne.s32.totalorder %s4444_s17, %s4173_s15  ;;  %s4178_s19 = scalar_lea.hbm %s4705_s0, 2048 }
  0x3b   : > { %p4179_p10 = scmp.lt.s32.totalorder %s4444_s17, %s4705_s0  ;;  %p4180_p1 = scmp.lt.s32.totalorder %s4178_s19, %s4173_s15 }
  0x3c   : > { %p4176_p0 = pnand %p4175_p11, %p4174_p6 }
  0x3d   : > { %p4181_p5 = por %p4180_p1, %p4179_p10 }
  0x3e   : > { %p4177_p7 = pneg %p4176_p0 }
  0x40   : > { %p4182_p2 = pnand %p4181_p5, %p4177_p7 }
  0x42   : > { %4185 = shalt.err (!%p4182_p2)
}
  0x43   : > { %s4186_s1 = scalar_lea.vmem %s4446_s11, 512  ;;  %s4275_s22 = smov [#allocation2]  }
  0x44   : > { %p4187_p8 = scmp.ne.s32.totalorder %s4446_s11, %s4186_s1  ;;  %s4191_s27 = sshll.u32 %s4275_s22, 4  ;;  %s4192_s27 = int_to_ptr.vmem [resolvable:$false] %s4191_s27 }
  0x45   : > { %s4193_s13 = scalar_lea.vmem %s4192_s27, 1024  ;;  %p4194_p12 = scmp.lt.s32.totalorder %s4446_s11, %s4192_s27 }
  0x46   : > { %p4189_p9 = pnand %p4187_p8, %p4175_p11  ;;  %p4195_p6 = scmp.lt.s32.totalorder %s4193_s13, %s4186_s1 }
  0x48   : > { %p4190_p4 = pneg %p4189_p9  ;;  %p4196_p0 = por %p4195_p6, %p4194_p12 }
  0x4a   : > { %p4197_p13 = pnand %p4196_p0, %p4190_p4 }
  0x4c   : > { %4200 = shalt.err (!%p4197_p13)
}
  0x4d   : > { %s4276_s14 = smov 256   ;;  %s4277_s26 = smov 16  }
  0x4e   : > { %3630 = dma.hbm_to_vmem [thread:$0]  (!%p4417_p3), %s4444_s17, 512, %s4446_s11, %s4448_s29, %s4276_s14, %s4276_s14, %s4277_s26  }
  0x4f   : > { %p4745_p11 = scmp.ne.s32.totalorder %s4741_s12, 0 }
  0x50   : > { %s4472_s15 = sand.u32 (!%p4745_p11), 1, %s4261_s18   ;;  %p4746_p13 = scmp.ne.s32.totalorder (!%p4745_p11), %s4736_s28, 0 }
  0x51   : > { %379 = sbr.rel (%p4745_p11) target bundleno = 1188 (0x4a4), region = 64  ;;  %s3279_s24 = sshll.u32 (!%p4745_p11), %s4472_s15, 5 }
  0x52   : > { %s382_s25 = scalar_lea.sflag (!%p4745_p11), [#allocation3], %s4472_s15  ;;  %s4478_s19 = scalar_lea.vmem (!%p4745_p11), [#allocation2], %s3279_s24 }
  0x56   : > { %4244 = dma.done.wait (%p4746_p13), %s382_s25, 512  }
  0x57   : > { %4246 = vsyncadd (%p4746_p13), %s382_s25, 4294966784  ;;  %p4747_p3 = scmp.eq.s32.totalorder %s4363_s21, 0 }
  0x59   : > { %4248 = dma.done.wait (%p4747_p3), [#allocation6], 36896   ;;  %p4748_p7 = pmov %p4747_p3 }
  0x5a   : > { %v4278_v0 = vmov 0   ;;  %v434_v1 = vld [vmem:[%s4478_s19 + $0x8] sm:$0xff]  ;;  %v436_v2 = vld [vmem:[%s4478_s19 + $0x18] sm:$0xff]  ;;  %v433_v3 = vld [vmem:[%s4478_s19] sm:$0xff]  ;;  %vm440_vm0 = vcmask 130048   ;;  %vm510_vm1 = vcmask 1041408  }
  0x5b   : > { %4250 = vsyncadd (%p4748_p7), [#allocation6], 4294930400  ;;  %476 = vmatprep.mubr.bf16.mxu1 %v4278_v0  ;;  %3682 = vset.pattern.permute.xlu0 %v4278_v0  ;;  %v438_v4 = vpack.c.bf16 %v436_v2, %v434_v1  ;;  %v435_v5 = vld [vmem:[%s4478_s19 + $0x10] sm:$0xff]  ;;  %v485_v6 = vld [vmem:[%s4707_s2] sm:$0xf]  ;;  %vm506_vm2 = vcmask 31744  }
  0x5c   : > { %779 = vmatprep.mubr.bf16.mxu0 %v4278_v0  ;;  %3683 = vset.pattern.permute.xlu1 %v4278_v0  ;;  %v437_v7 = vpack.c.bf16 %v435_v5, %v433_v3  ;;  %v439_v8 = vld [vmem:[#allocation5] sm:$0x3]  ;;  %v3298_v28 = vld [vmem:[%s4709_s4 + $0xa] sm:$0x3]  ;;  %v3286_v30 = vld [vmem:[%s4709_s4 + $0x2] sm:$0x3] }
  0x5d   : > { %488 = vperm.xlu0 %3682, %v485_v6   ;;  %v493_v9 = vld [vmem:[%s4708_s3] sm:$0xf]  ;;  %458 = vmatprep.subr.bf16.mxu1 %v438_v4  ;;  %v3304_v31 = vld [vmem:[%s4709_s4 + $0xe] sm:$0x3]  ;;  %v3684_v32 = vld [vmem:[#allocation7 + $0x70] ss:$8 sps:$4 sm:$0xff]  }
  0x5e   : > { %459 = vmatpush1.bf16.msra.mxu1 %v437_v7  ;;  %v3120_v10 = vld [vmem:[%s4713_s8] sm:$0xff]  ;;  %v3690_v37 = vld [vmem:[#allocation7 + $0x50] ss:$8 sps:$4 sm:$0xff]   ;;  %v3295_v46 = vld [vmem:[%s4709_s4 + $0x8] sm:$0x3]  ;;  %s431_s23 = scalar_lea.vmem [#allocation8], %s3279_s24 }
  0x5f   : > { %v3136_v11 = vld [vmem:[%s4714_s9] sm:$0xff]  ;;  %v3702_v42 = vld [vmem:[#allocation7 + $0x30] ss:$8 sps:$4 sm:$0xff]   ;;  %v3301_v51 = vld [vmem:[%s4709_s4 + $0xc] sm:$0x3]  ;;  %s3178_s30 = sshll.u32 %s431_s23, 4  ;;  %s4657_s30 = int_to_ptr.vmem [resolvable:$true] %s3178_s30 }
  0x60   : > { %v505_v27 = vld [vmem:[%s4709_s4] sm:$0x3]  ;;  %v3689_v33 = vld [vmem:[#allocation7 + $0x64] ss:$8 sps:$4 sm:$0xff]   ;;  %v3687_v34 = vld [vmem:[#allocation7 + $0x60] ss:$8 sps:$4 sm:$0xff]  }
  0x61   : > { %496 = vperm.xlu0 %3682, %v493_v9   ;;  %3283 = vmatmul.mubr.msk.bf16.vlgmr.msra.gmra.mxu1 %vm440_vm0, %v439_v8  ;;  %v3686_v29 = vld [vmem:[#allocation7 + $0x74] ss:$8 sps:$4 sm:$0xff]   ;;  %v3289_v36 = vld [vmem:[%s4709_s4 + $0x4] sm:$0x3]  ;;  %v3698_v38 = vld [vmem:[#allocation7 + $0x44] ss:$8 sps:$4 sm:$0xff]  }
  0x62   : > { %549 = vmatprep.mubr.bf16.mxu1 %v4278_v0  ;;  %v3692_v35 = vld [vmem:[#allocation7 + $0x54] ss:$8 sps:$4 sm:$0xff]   ;;  %v3696_v39 = vld [vmem:[#allocation7 + $0x40] ss:$8 sps:$4 sm:$0xff]   ;;  %v3292_v41 = vld [vmem:[%s4709_s4 + $0x6] sm:$0x3] }
  0x63   : > { %v3704_v40 = vld [vmem:[#allocation7 + $0x34] ss:$8 sps:$4 sm:$0xff]   ;;  %v3710_v43 = vld [vmem:[#allocation7 + $0x24] ss:$8 sps:$4 sm:$0xff]   ;;  %v3708_v44 = vld [vmem:[#allocation7 + $0x20] ss:$8 sps:$4 sm:$0xff]  }
  0x64   : > { %v3716_v45 = vld [vmem:[#allocation7 + $0x14] ss:$8 sps:$4 sm:$0xff]   ;;  %v3714_v47 = vld [vmem:[#allocation7 + $0x10] ss:$8 sps:$4 sm:$0xff]   ;;  %v3722_v48 = vld [vmem:[#allocation7 + $0x4] ss:$8 sps:$4 sm:$0xff]  }
  0x65   : > { %3124 = vperm.xlu0 %3682, %v3120_v10   ;;  %v3720_v49 = vld [vmem:[#allocation7] ss:$8 sps:$4 sm:$0xff]   ;;  %v3728_v50 = vld [vmem:[#allocation7 + $0xf4] ss:$8 sps:$4 sm:$0xff]   ;;  %v3726_v53 = vld [vmem:[#allocation7 + $0xf0] ss:$8 sps:$4 sm:$0xff]  }
  0x66   : > { %v3695_v52 = vld [vmem:[#allocation7 + $0x174] ss:$8 sps:$4 sm:$0xff]   ;;  %v3734_v54 = vld [vmem:[#allocation7 + $0xe4] ss:$8 sps:$4 sm:$0xff]   ;;  %v3732_v55 = vld [vmem:[#allocation7 + $0xe0] ss:$8 sps:$4 sm:$0xff]  }
  0x67   : > { %v3740_v56 = vld [vmem:[#allocation7 + $0xd4] ss:$8 sps:$4 sm:$0xff]   ;;  %v3693_v57 = vld [vmem:[#allocation7 + $0x170] ss:$8 sps:$4 sm:$0xff]   ;;  %v3307_v58 = vld [vmem:[%s4709_s4 + $0x10] sm:$0x3] }
  0x68   : > { %v3701_v59 = vld [vmem:[#allocation7 + $0x164] ss:$8 sps:$4 sm:$0xff]   ;;  %v3738_v60 = vld [vmem:[#allocation7 + $0xd0] ss:$8 sps:$4 sm:$0xff]   ;;  %v3699_v62 = vld [vmem:[#allocation7 + $0x160] ss:$8 sps:$4 sm:$0xff]  }
  0x69   : > { %3140 = vperm.xlu0 %3682, %v3136_v11   ;;  %v3746_v61 = vld [vmem:[#allocation7 + $0xc4] ss:$8 sps:$4 sm:$0xff]   ;;  %v3707_v63 = vld [vmem:[#allocation7 + $0x154] ss:$8 sps:$4 sm:$0xff]   ;;  %v3744_v1 = vld [vmem:[#allocation7 + $0xc0] ss:$8 sps:$4 sm:$0xff]  }
  0x6a   : > { %v3752_v2 = vld [vmem:[#allocation7 + $0xb4] ss:$8 sps:$4 sm:$0xff]   ;;  %v3705_v3 = vld [vmem:[#allocation7 + $0x150] ss:$8 sps:$4 sm:$0xff]   ;;  %v3713_v4 = vld [vmem:[#allocation7 + $0x144] ss:$8 sps:$4 sm:$0xff]  }
  0x6b   : > { %v3750_v5 = vld [vmem:[#allocation7 + $0xb0] ss:$8 sps:$4 sm:$0xff]   ;;  %v3758_v6 = vld [vmem:[#allocation7 + $0xa4] ss:$8 sps:$4 sm:$0xff]   ;;  %v3711_v7 = vld [vmem:[#allocation7 + $0x140] ss:$8 sps:$4 sm:$0xff]  }
  0x6c   : > { %v3719_v8 = vld [vmem:[#allocation7 + $0x134] ss:$8 sps:$4 sm:$0xff]   ;;  %v3756_v9 = vld [vmem:[#allocation7 + $0xa0] ss:$8 sps:$4 sm:$0xff]   ;;  %v3717_v11 = vld [vmem:[#allocation7 + $0x130] ss:$8 sps:$4 sm:$0xff]  }
  0x6d   : > { %v3764_v10 = vld [vmem:[#allocation7 + $0x94] ss:$8 sps:$4 sm:$0xff]   ;;  %s4749_s1 = sld [smem:[#allocation16_spill]]  ;;  %s3607_s22 = sshll.u32 %s4363_s21, 9 }
  0x6e   : > { %s4750_s13 = sld [smem:[#allocation19_spill]]  ;;  %s3165_s26 = scalar_lea.sflag [#allocation4], %s4472_s15 }
  0x6f   : > { %s4201_s25 = scalar_lea.vmem %s4657_s30, 512  ;;  %s4279_s21 = smov [#allocation8]  }
  0x70   : > { %p4202_p10 = scmp.ne.s32.totalorder %s4657_s30, %s4201_s25  ;;  %s4205_s11 = sshll.u32 %s4279_s21, 4  ;;  %s4206_s11 = int_to_ptr.vmem [resolvable:$false] %s4205_s11 }
  0x71   : > { %s4207_s17 = scalar_lea.vmem %s4206_s11, 1024  ;;  %p4208_p8 = scmp.lt.s32.totalorder %s4657_s30, %s4206_s11 }
  0x72   : > { %p4209_p9 = scmp.lt.s32.totalorder %s4207_s17, %s4201_s25 }
  0x73   : > { %p4751_p1 = scmp.ne.s32.totalorder %s4749_s1, 0 }
  0x74   : > { %s4663_s14 = scalar_lea.hbm %s4750_s13, %s3607_s22  ;;  %p4210_p4 = por %p4209_p9, %p4208_p8 }
  0x75   : > { %p4203_p5 = pnand %p4202_p10, %p4751_p1 }
  0x77   : > { %p4204_p2 = pneg %p4203_p5 }
  0x79   : > { %p4211_p12 = pnand %p4210_p4, %p4204_p2 }
  0xd8   : > { %v489_v12 = vpop.permute.xlu0 %488 }
  0xdc   : > { %v497_v15 = vpop.permute.xlu0 %496 }
 0x121   : > { %v478_v13 = vpop.f32.mrf.mxu1 }
 0x122   : > { %v491_v14 = vmul.f32 %v489_v12, %v478_v13  ;;  %v3762_v13 = vld [vmem:[#allocation7 + $0x90] ss:$8 sps:$4 sm:$0xff]  }
 0x123   : > { %v480_v16 = vpop.f32.mrf.mxu1 }
 0x124   : > { %v499_v17 = vadd.f32 %v497_v15, %v491_v14  ;;  %v492_v18 = vmul.f32 %v489_v12, %v480_v16  ;;  %v3725_v12 = vld [vmem:[#allocation7 + $0x124] ss:$8 sps:$4 sm:$0xff]   ;;  %v3731_v16 = vld [vmem:[#allocation7 + $0x114] ss:$8 sps:$4 sm:$0xff]  }
 0x125   : > { %v482_v19 = vpop.f32.mrf.mxu1  ;;  %v3770_v14 = vld [vmem:[#allocation7 + $0x84] ss:$8 sps:$4 sm:$0xff]  }
 0x126   : > { %v501_v20 = vmax.f32 %v499_v17, 0.0  ;;  %v500_v21 = vadd.f32 %v497_v15, %v492_v18  ;;  %v3723_v15 = vld [vmem:[#allocation7 + $0x120] ss:$8 sps:$4 sm:$0xff]   ;;  %v3779_v18 = vld [vmem:[#allocation7 + $0x274] ss:$8 sps:$4 sm:$0xff]  }
 0x127   : > { %v483_v22 = vpop.f32.mrf.mxu1  ;;  %v3768_v17 = vld [vmem:[#allocation7 + $0x80] ss:$8 sps:$4 sm:$0xff]   ;;  %v3729_v19 = vld [vmem:[#allocation7 + $0x110] ss:$8 sps:$4 sm:$0xff]  }
 0x128   : > { %v503_v23 = vpack.c.bf16 %v501_v20, %v501_v20  ;;  %v502_v24 = vmax.f32 %v500_v21, 0.0  ;;  %v3737_v20 = vld [vmem:[#allocation7 + $0x104] ss:$8 sps:$4 sm:$0xff]   ;;  %v3735_v21 = vld [vmem:[#allocation7 + $0x100] ss:$8 sps:$4 sm:$0xff]  }
 0x129   : > { %v3743_v22 = vld [vmem:[#allocation7 + $0x1f4] ss:$8 sps:$4 sm:$0xff]  }
 0x12a   : > { %v4509_v25 = vpack.c.bf16 %v502_v24, %v502_v24  ;;  %v4512_v26 = vsel %vm510_vm1, %v503_v23, 0  ;;  %v3741_v23 = vld [vmem:[#allocation7 + $0x1f0] ss:$8 sps:$4 sm:$0xff]   ;;  %v3749_v24 = vld [vmem:[#allocation7 + $0x1e4] ss:$8 sps:$4 sm:$0xff]  }
 0x12c   : > { %3284 = vmatprep.subr.msk.bf16.mxu1 %vm510_vm1, %v4509_v25  ;;  %3299 = vmatprep.subr.msk.bf16.mxu0 %vm510_vm1, %v4509_v25 }
 0x12d   : > { %532 = vmatpush1.bf16.msra.mxu1 %v4512_v26  ;;  %762 = vmatpush1.bf16.msra.mxu0 %v4512_v26 }
 0x12e   : > { %3287 = vmatprep.subr.msk.bf16.mxu1 %vm510_vm1, %v4509_v25  ;;  %3305 = vmatprep.subr.msk.bf16.mxu0 %vm510_vm1, %v4509_v25 }
 0x130   : > { %3285 = vmatmul.mubr.msk.bf16.vlgmr.msra.gmra.mxu1 %vm506_vm2, %v505_v27  ;;  %3300 = vmatmul.mubr.msk.bf16.vlgmr.msra.gmra.mxu0 %vm506_vm2, %v3298_v28  ;;  %v3753_v27 = vld [vmem:[#allocation7 + $0x1d0] ss:$8 sps:$4 sm:$0xff]   ;;  %v3761_v28 = vld [vmem:[#allocation7 + $0x1c4] ss:$8 sps:$4 sm:$0xff]  }
 0x131   : > { %578 = vmatpush1.bf16.msra.mxu1 %v4512_v26  ;;  %854 = vmatpush1.bf16.msra.mxu0 %v4512_v26 }
 0x132   : > { %3290 = vmatprep.subr.msk.bf16.mxu1 %vm510_vm1, %v4509_v25  ;;  %595 = vmatprep.mubr.bf16.mxu1 %v4278_v0 }
 0x133   : > { %871 = vmatprep.mubr.bf16.mxu0 %v4278_v0  ;;  %2672 = vmatprep.subr.bf16.mxu0 %v3686_v29  ;;  %v3759_v29 = vld [vmem:[#allocation7 + $0x1c0] ss:$8 sps:$4 sm:$0xff]  }
 0x138   : > { %3288 = vmatmul.mubr.msk.bf16.vlgmr.msra.gmra.mxu1 %vm506_vm2, %v3286_v30  ;;  %3306 = vmatmul.mubr.msk.bf16.vlgmr.msra.gmra.mxu0 %vm506_vm2, %v3304_v31  ;;  %v3767_v30 = vld [vmem:[#allocation7 + $0x1b4] ss:$8 sps:$4 sm:$0xff]   ;;  %v3765_v31 = vld [vmem:[#allocation7 + $0x1b0] ss:$8 sps:$4 sm:$0xff]  }
 0x139   : > { %624 = vmatpush1.bf16.msra.mxu1 %v4512_v26  ;;  %641 = vmatprep.mubr.bf16.mxu1 %v4278_v0 }
 0x13a   : > { %3293 = vmatprep.subr.msk.bf16.mxu1 %vm510_vm1, %v4509_v25  ;;  %2673 = vmatpush1.bf16.msra.mxu0 %v3684_v32  ;;  %v3773_v32 = vld [vmem:[#allocation7 + $0x1a4] ss:$8 sps:$4 sm:$0xff]  }
 0x13b   : > { %2674 = vmatprep.subr.bf16.mxu0 %v3689_v33  ;;  %v3771_v33 = vld [vmem:[#allocation7 + $0x1a0] ss:$8 sps:$4 sm:$0xff]  }
 0x13e   : > { %2675 = vmatpush1.bf16.msra.mxu0 %v3687_v34  ;;  %v3776_v34 = vld [vmem:[#allocation7 + $0x194] ss:$8 sps:$4 sm:$0xff]  }
 0x13f   : > { %2676 = vmatprep.subr.bf16.mxu0 %v3692_v35  ;;  %v3774_v35 = vld [vmem:[#allocation7 + $0x190] ss:$8 sps:$4 sm:$0xff]  }
 0x140   : > { %3291 = vmatmul.mubr.msk.bf16.vlgmr.msra.gmra.mxu1 %vm506_vm2, %v3289_v36  ;;  %v3782_v36 = vld [vmem:[#allocation7 + $0x184] ss:$8 sps:$4 sm:$0xff]  }
 0x141   : > { %670 = vmatpush1.bf16.msra.mxu1 %v4512_v26  ;;  %687 = vmatprep.mubr.bf16.mxu1 %v4278_v0 }
 0x142   : > { %3296 = vmatprep.subr.msk.bf16.mxu1 %vm510_vm1, %v4509_v25  ;;  %2677 = vmatpush1.bf16.msra.mxu0 %v3690_v37  ;;  %v3780_v37 = vld [vmem:[#allocation7 + $0x180] ss:$8 sps:$4 sm:$0xff]  }
 0x143   : > { %2678 = vmatprep.subr.bf16.mxu0 %v3698_v38  ;;  %v3791_v38 = vld [vmem:[#allocation7 + $0x374] ss:$8 sps:$4 sm:$0xff]  }
 0x146   : > { %2679 = vmatpush1.bf16.msra.mxu0 %v3696_v39 }
 0x147   : > { %2680 = vmatprep.subr.bf16.mxu0 %v3704_v40 }
 0x148   : > { %3294 = vmatmul.mubr.msk.bf16.vlgmr.msra.gmra.mxu1 %vm506_vm2, %v3292_v41 }
 0x149   : > { %716 = vmatpush1.bf16.msra.mxu1 %v4512_v26  ;;  %733 = vmatprep.mubr.bf16.mxu1 %v4278_v0 }
 0x14a   : > { %3302 = vmatprep.subr.msk.bf16.mxu1 %vm510_vm1, %v4509_v25  ;;  %2681 = vmatpush1.bf16.msra.mxu0 %v3702_v42 }
 0x14b   : > { %2682 = vmatprep.subr.bf16.mxu0 %v3710_v43 }
 0x14e   : > { %2683 = vmatpush1.bf16.msra.mxu0 %v3708_v44  ;;  %v3777_v44 = vld [vmem:[#allocation7 + $0x270] ss:$8 sps:$4 sm:$0xff]  }
 0x14f   : > { %2684 = vmatprep.subr.bf16.mxu0 %v3716_v45 }
 0x150   : > { %3297 = vmatmul.mubr.msk.bf16.vlgmr.msra.gmra.mxu1 %vm506_vm2, %v3295_v46 }
 0x151   : > { %808 = vmatpush1.bf16.msra.mxu1 %v4512_v26  ;;  %825 = vmatprep.mubr.bf16.mxu1 %v4278_v0 }
 0x152   : > { %3308 = vmatprep.subr.msk.bf16.mxu1 %vm510_vm1, %v4509_v25  ;;  %2685 = vmatpush1.bf16.msra.mxu0 %v3714_v47  ;;  %v3747_v25 = vld [vmem:[#allocation7 + $0x1e0] ss:$8 sps:$4 sm:$0xff]   ;;  %v3785_v47 = vld [vmem:[#allocation7 + $0x264] ss:$8 sps:$4 sm:$0xff]  }
 0x153   : > { %2686 = vmatprep.subr.bf16.mxu0 %v3722_v48 }
 0x156   : > { %2687 = vmatpush1.bf16.msra.mxu0 %v3720_v49 }
 0x157   : > { %2688 = vmatprep.subr.bf16.mxu0 %v3728_v50 }
 0x158   : > { %3303 = vmatmul.mubr.msk.bf16.vlgmr.msra.gmra.mxu1 %vm506_vm2, %v3301_v51  ;;  %v3783_v51 = vld [vmem:[#allocation7 + $0x260] ss:$8 sps:$4 sm:$0xff]  }
 0x159   : > { %900 = vmatpush1.bf16.msra.mxu1 %v4512_v26  ;;  %917 = vmatprep.mubr.bf16.mxu1 %v4278_v0  ;;  %v3755_v26 = vld [vmem:[#allocation7 + $0x1d4] ss:$8 sps:$4 sm:$0xff]  }
 0x15a   : > { %2713 = vmatprep.subr.bf16.mxu1 %v3695_v52  ;;  %2689 = vmatpush2.bf16.msra.mxu0 %v3726_v53  ;;  %v3788_v53 = vld [vmem:[#allocation7 + $0x254] ss:$8 sps:$4 sm:$0xff]  }
 0x15b   : > { %2690 = vmatprep.subr.bf16.mxu0 %v3734_v54 }
 0x15e   : > { %2691 = vmatpush2.bf16.msra.mxu0 %v3732_v55 }
 0x15f   : > { %2692 = vmatprep.subr.bf16.mxu0 %v3740_v56 }
 0x160   : > { %3309 = vmatmul.mubr.msk.bf16.vlgmr.msra.gmra.mxu1 %vm506_vm2, %v3307_v58 }
 0x161   : > { %2714 = vmatpush1.bf16.msra.mxu1 %v3693_v57 }
 0x162   : > { %2715 = vmatprep.subr.bf16.mxu1 %v3701_v59  ;;  %2693 = vmatpush2.bf16.msra.mxu0 %v3738_v60  ;;  %v3786_v59 = vld [vmem:[#allocation7 + $0x250] ss:$8 sps:$4 sm:$0xff]  }
 0x163   : > { %2694 = vmatprep.subr.bf16.mxu0 %v3746_v61  ;;  %v3789_v60 = vld [vmem:[#allocation7 + $0x370] ss:$8 sps:$4 sm:$0xff]   ;;  %v3794_v61 = vld [vmem:[#allocation7 + $0x244] ss:$8 sps:$4 sm:$0xff]  }
 0x165   : > { %2716 = vmatpush1.bf16.msra.mxu1 %v3699_v62  ;;  %v3797_v62 = vld [vmem:[#allocation7 + $0x364] ss:$8 sps:$4 sm:$0xff]  }
 0x166   : > { %2717 = vmatprep.subr.bf16.mxu1 %v3707_v63  ;;  %2695 = vmatpush2.bf16.msra.mxu0 %v3744_v1 }
 0x167   : > { %2696 = vmatprep.subr.bf16.mxu0 %v3752_v2 }
 0x169   : > { %2718 = vmatpush1.bf16.msra.mxu1 %v3705_v3 }
 0x16a   : > { %2719 = vmatprep.subr.bf16.mxu1 %v3713_v4  ;;  %2697 = vmatpush2.bf16.msra.mxu0 %v3750_v5  ;;  %v3792_v4 = vld [vmem:[#allocation7 + $0x240] ss:$8 sps:$4 sm:$0xff]  }
 0x16b   : > { %2698 = vmatprep.subr.bf16.mxu0 %v3758_v6  ;;  %v3795_v5 = vld [vmem:[#allocation7 + $0x360] ss:$8 sps:$4 sm:$0xff]   ;;  %v3800_v6 = vld [vmem:[#allocation7 + $0x234] ss:$8 sps:$4 sm:$0xff]  }
 0x16d   : > { %2720 = vmatpush1.bf16.msra.mxu1 %v3711_v7  ;;  %v3803_v7 = vld [vmem:[#allocation7 + $0x354] ss:$8 sps:$4 sm:$0xff]  }
 0x16e   : > { %2721 = vmatprep.subr.bf16.mxu1 %v3719_v8  ;;  %2699 = vmatpush2.bf16.msra.mxu0 %v3756_v9 }
 0x16f   : > { %2700 = vmatprep.subr.bf16.mxu0 %v3764_v10  ;;  %v3798_v10 = vld [vmem:[#allocation7 + $0x230] ss:$8 sps:$4 sm:$0xff]  }
 0x171   : > { %2722 = vmatpush1.bf16.msra.mxu1 %v3717_v11  ;;  %v3801_v11 = vld [vmem:[#allocation7 + $0x350] ss:$8 sps:$4 sm:$0xff]  }
 0x172   : > { %2723 = vmatprep.subr.bf16.mxu1 %v3725_v12  ;;  %2701 = vmatpush2.bf16.msra.mxu0 %v3762_v13  ;;  %v3806_v13 = vld [vmem:[#allocation7 + $0x224] ss:$8 sps:$4 sm:$0xff]  }
 0x173   : > { %2702 = vmatprep.subr.bf16.mxu0 %v3770_v14  ;;  %v3809_v14 = vld [vmem:[#allocation7 + $0x344] ss:$8 sps:$4 sm:$0xff]  }
 0x175   : > { %2724 = vmatpush1.bf16.msra.mxu1 %v3723_v15 }
 0x176   : > { %2725 = vmatprep.subr.bf16.mxu1 %v3731_v16  ;;  %2703 = vmatpush2.bf16.msra.mxu0 %v3768_v17  ;;  %v3804_v17 = vld [vmem:[#allocation7 + $0x220] ss:$8 sps:$4 sm:$0xff]  }
 0x177   : > { %2754 = vmatprep.subr.bf16.mxu0 %v3779_v18  ;;  %v3807_v18 = vld [vmem:[#allocation7 + $0x340] ss:$8 sps:$4 sm:$0xff]  }
 0x179   : > { %2726 = vmatpush1.bf16.msra.mxu1 %v3729_v19  ;;  %v3812_v19 = vld [vmem:[#allocation7 + $0x214] ss:$8 sps:$4 sm:$0xff]  }
 0x17a   : > { %2727 = vmatprep.subr.bf16.mxu1 %v3737_v20  ;;  %v3815_v20 = vld [vmem:[#allocation7 + $0x334] ss:$8 sps:$4 sm:$0xff]  }
 0x17d   : > { %2728 = vmatpush1.bf16.msra.mxu1 %v3735_v21 }
 0x17e   : > { %2729 = vmatprep.subr.bf16.mxu1 %v3743_v22 }
 0x181   : > { %2730 = vmatpush2.bf16.msra.mxu1 %v3741_v23  ;;  %v3810_v23 = vld [vmem:[#allocation7 + $0x210] ss:$8 sps:$4 sm:$0xff]  }
 0x182   : > { %2731 = vmatprep.subr.bf16.mxu1 %v3749_v24  ;;  %v3813_v24 = vld [vmem:[#allocation7 + $0x330] ss:$8 sps:$4 sm:$0xff]  }
 0x185   : > { %2732 = vmatpush2.bf16.msra.mxu1 %v3747_v25 }
 0x186   : > { %2733 = vmatprep.subr.bf16.mxu1 %v3755_v26  ;;  %v3818_v26 = vld [vmem:[#allocation7 + $0x204] ss:$8 sps:$4 sm:$0xff]  }
 0x189   : > { %2734 = vmatpush2.bf16.msra.mxu1 %v3753_v27  ;;  %v3821_v27 = vld [vmem:[#allocation7 + $0x324] ss:$8 sps:$4 sm:$0xff]  }
 0x18a   : > { %2735 = vmatprep.subr.bf16.mxu1 %v3761_v28 }
 0x18d   : > { %2736 = vmatpush2.bf16.msra.mxu1 %v3759_v29 }
 0x18e   : > { %2737 = vmatprep.subr.bf16.mxu1 %v3767_v30  ;;  %v3816_v30 = vld [vmem:[#allocation7 + $0x200] ss:$8 sps:$4 sm:$0xff]  }
 0x191   : > { %2738 = vmatpush2.bf16.msra.mxu1 %v3765_v31  ;;  %v3819_v31 = vld [vmem:[#allocation7 + $0x320] ss:$8 sps:$4 sm:$0xff]  }
 0x192   : > { %2739 = vmatprep.subr.bf16.mxu1 %v3773_v32  ;;  %v3824_v32 = vld [vmem:[#allocation7 + $0x2f4] ss:$8 sps:$4 sm:$0xff]  }
 0x195   : > { %2740 = vmatpush2.bf16.msra.mxu1 %v3771_v33  ;;  %v3827_v33 = vld [vmem:[#allocation7 + $0x314] ss:$8 sps:$4 sm:$0xff]  }
 0x196   : > { %2741 = vmatprep.subr.bf16.mxu1 %v3776_v34 }
 0x199   : > { %2742 = vmatpush2.bf16.msra.mxu1 %v3774_v35 }
 0x19a   : > { %2743 = vmatprep.subr.bf16.mxu1 %v3782_v36  ;;  %v3822_v36 = vld [vmem:[#allocation7 + $0x2f0] ss:$8 sps:$4 sm:$0xff]  }
 0x19d   : > { %2744 = vmatpush2.bf16.msra.mxu1 %v3780_v37  ;;  %v3825_v37 = vld [vmem:[#allocation7 + $0x310] ss:$8 sps:$4 sm:$0xff]  }
 0x19e   : > { %2795 = vmatprep.subr.bf16.mxu1 %v3791_v38  ;;  %v3830_v38 = vld [vmem:[#allocation7 + $0x2e4] ss:$8 sps:$4 sm:$0xff]  }
 0x1f0   : > { %v551_v39 = vpop.f32.mrf.mxu1  ;;  %v4584_v40 = vpop.f32.mrf.mxu0 }
 0x1f1   : > { %v926_v45 = vpack.c.bf16 %v551_v39, %v551_v39  ;;  %v3833_v39 = vld [vmem:[#allocation7 + $0x304] ss:$8 sps:$4 sm:$0xff]  }
 0x1f2   : > { %v553_v41 = vpop.f32.mrf.mxu1  ;;  %v4586_v42 = vpop.f32.mrf.mxu0 }
 0x1f3   : > { %v927_v43 = vpack.c.bf16 %v553_v41, %v553_v41 }
 0x1f4   : > { %v555_v46 = vpop.f32.mrf.mxu1  ;;  %v785_v48 = vpop.f32.mrf.mxu0 }
 0x1f5   : > { %2704 = vmatprep.mubr.bf16.mxu0 %v927_v43  ;;  %v3836_v46 = vld [vmem:[#allocation7 + $0x2d4] ss:$8 sps:$4 sm:$0xff]   ;;  %v3834_v48 = vld [vmem:[#allocation7 + $0x2d0] ss:$8 sps:$4 sm:$0xff]  }
 0x1f6   : > { %v556_v49 = vpop.f32.mrf.mxu1  ;;  %2705 = vmatmul.mubr.bf16.vlgmr.msra.gmra.mxu0 %v926_v45  ;;  %v786_v50 = vpop.f32.mrf.mxu0  ;;  %v3831_v45 = vld [vmem:[#allocation7 + $0x300] ss:$8 sps:$4 sm:$0xff]  }
 0x1f7   : > { %2755 = vmatpush1.bf16.msra.mxu0 %v3777_v44  ;;  %v3828_v44 = vld [vmem:[#allocation7 + $0x2e0] ss:$8 sps:$4 sm:$0xff]   ;;  %v3837_v49 = vld [vmem:[#allocation7 + $0x3f0] ss:$8 sps:$4 sm:$0xff]   ;;  %v3842_v50 = vld [vmem:[#allocation7 + $0x2c4] ss:$8 sps:$4 sm:$0xff]  }
 0x1f8   : > { %v597_v52 = vpop.f32.mrf.mxu1  ;;  %2756 = vmatprep.subr.bf16.mxu0 %v3785_v47  ;;  %v4588_v54 = vpop.f32.mrf.mxu0  ;;  %v3839_v47 = vld [vmem:[#allocation7 + $0x3f4] ss:$8 sps:$4 sm:$0xff]  }
 0x1f9   : > { %v928_v55 = vpack.c.bf16 %v597_v52, %v597_v52  ;;  %v3840_v52 = vld [vmem:[#allocation7 + $0x2c0] ss:$8 sps:$4 sm:$0xff]  }
 0x1fa   : > { %v599_v56 = vpop.f32.mrf.mxu1  ;;  %v4590_v57 = vpop.f32.mrf.mxu0 }
 0x1fb   : > { %v929_v58 = vpack.c.bf16 %v599_v56, %v599_v56  ;;  %2757 = vmatpush1.bf16.msra.mxu0 %v3783_v51  ;;  %v3845_v51 = vld [vmem:[#allocation7 + $0x3e4] ss:$8 sps:$4 sm:$0xff]   ;;  %v3851_v56 = vld [vmem:[#allocation7 + $0x3d4] ss:$8 sps:$4 sm:$0xff]  }
 0x1fc   : > { %2758 = vmatprep.subr.bf16.mxu0 %v3788_v53  ;;  %v601_v63 = vpop.f32.mrf.mxu1  ;;  %v877_v1 = vpop.f32.mrf.mxu0  ;;  %v3843_v53 = vld [vmem:[#allocation7 + $0x3e0] ss:$8 sps:$4 sm:$0xff]  }
 0x1fd   : > { %2745 = vmatprep.mubr.bf16.mxu1 %v929_v58  ;;  %v3846_v58 = vld [vmem:[#allocation7 + $0x2b0] ss:$8 sps:$4 sm:$0xff]   ;;  %v3852_v63 = vld [vmem:[#allocation7 + $0x2a0] ss:$8 sps:$4 sm:$0xff]  }
 0x1fe   : > { %2746 = vmatmul.mubr.bf16.vlgmr.msra.gmra.mxu1 %v928_v55  ;;  %v602_v2 = vpop.f32.mrf.mxu1  ;;  %v878_v3 = vpop.f32.mrf.mxu0  ;;  %v3848_v55 = vld [vmem:[#allocation7 + $0x2b4] ss:$8 sps:$4 sm:$0xff]   ;;  %v3855_v1 = vld [vmem:[#allocation7 + $0x3c0] ss:$8 sps:$4 sm:$0xff]  }
 0x1ff   : > { %2759 = vmatpush1.bf16.msra.mxu0 %v3786_v59  ;;  %2796 = vmatpush1.bf16.msra.mxu1 %v3789_v60  ;;  %v3849_v59 = vld [vmem:[#allocation7 + $0x3d0] ss:$8 sps:$4 sm:$0xff]   ;;  %v3854_v60 = vld [vmem:[#allocation7 + $0x2a4] ss:$8 sps:$4 sm:$0xff]   ;;  %v3860_v3 = vld [vmem:[#allocation7 + $0x294] ss:$8 sps:$4 sm:$0xff]  }
 0x200   : > { %2760 = vmatprep.subr.bf16.mxu0 %v3794_v61  ;;  %2797 = vmatprep.subr.bf16.mxu1 %v3797_v62  ;;  %v4592_v8 = vpop.f32.mrf.mxu1  ;;  %v3857_v61 = vld [vmem:[#allocation7 + $0x3c4] ss:$8 sps:$4 sm:$0xff]  }
 0x202   : > { %v645_v9 = vpop.f32.mrf.mxu1 }
 0x203   : > { %2761 = vmatpush1.bf16.msra.mxu0 %v3792_v4  ;;  %2798 = vmatpush1.bf16.msra.mxu1 %v3795_v5  ;;  %v931_v12 = vpack.c.bf16 %v645_v9, %v645_v9  ;;  %v3863_v4 = vld [vmem:[#allocation7 + $0x3b4] ss:$8 sps:$4 sm:$0xff]  }
 0x204   : > { %2762 = vmatprep.subr.bf16.mxu0 %v3800_v6  ;;  %2799 = vmatprep.subr.bf16.mxu1 %v3803_v7  ;;  %v647_v15 = vpop.f32.mrf.mxu1  ;;  %v3858_v6 = vld [vmem:[#allocation7 + $0x290] ss:$8 sps:$4 sm:$0xff]  }
 0x205   : > { %2786 = vmatprep.mubr.bf16.mxu0 %v931_v12  ;;  %v3861_v7 = vld [vmem:[#allocation7 + $0x3b0] ss:$8 sps:$4 sm:$0xff]  }
 0x206   : > { %v648_v16 = vpop.f32.mrf.mxu1 }
 0x207   : > { %2763 = vmatpush1.bf16.msra.mxu0 %v3798_v10  ;;  %2800 = vmatpush1.bf16.msra.mxu1 %v3801_v11  ;;  %v3866_v10 = vld [vmem:[#allocation7 + $0x284] ss:$8 sps:$4 sm:$0xff]   ;;  %v3872_v16 = vld [vmem:[#allocation7 + $0x394] ss:$8 sps:$4 sm:$0xff]  }
 0x208   : > { %2764 = vmatprep.subr.bf16.mxu0 %v3806_v13  ;;  %2801 = vmatprep.subr.bf16.mxu1 %v3809_v14  ;;  %v4594_v21 = vpop.f32.mrf.mxu1  ;;  %v3869_v11 = vld [vmem:[#allocation7 + $0x3a4] ss:$8 sps:$4 sm:$0xff]   ;;  %v3864_v13 = vld [vmem:[#allocation7 + $0x280] ss:$8 sps:$4 sm:$0xff]  }
 0x209   : > { %v3867_v14 = vld [vmem:[#allocation7 + $0x3a0] ss:$8 sps:$4 sm:$0xff]  }
 0x20a   : > { %v691_v22 = vpop.f32.mrf.mxu1 }
 0x20b   : > { %2765 = vmatpush1.bf16.msra.mxu0 %v3804_v17  ;;  %2802 = vmatpush1.bf16.msra.mxu1 %v3807_v18  ;;  %v933_v25 = vpack.c.bf16 %v691_v22, %v691_v22  ;;  %v3875_v17 = vld [vmem:[#allocation7 + $0x474] ss:$8 sps:$4 sm:$0xff]  }
 0x20c   : > { %2766 = vmatprep.subr.bf16.mxu0 %v3812_v19  ;;  %2803 = vmatprep.subr.bf16.mxu1 %v3815_v20  ;;  %v693_v28 = vpop.f32.mrf.mxu1  ;;  %v3870_v19 = vld [vmem:[#allocation7 + $0x390] ss:$8 sps:$4 sm:$0xff]  }
 0x20d   : > { %2827 = vmatprep.mubr.bf16.mxu1 %v933_v25  ;;  %v3873_v20 = vld [vmem:[#allocation7 + $0x470] ss:$8 sps:$4 sm:$0xff]   ;;  %v3881_v25 = vld [vmem:[#allocation7 + $0x464] ss:$8 sps:$4 sm:$0xff]   ;;  %v3879_v28 = vld [vmem:[#allocation7 + $0x460] ss:$8 sps:$4 sm:$0xff]  }
 0x20e   : > { %v694_v29 = vpop.f32.mrf.mxu1 }
 0x20f   : > { %2767 = vmatpush1.bf16.msra.mxu0 %v3810_v23  ;;  %2804 = vmatpush1.bf16.msra.mxu1 %v3813_v24  ;;  %v930_v23 = vpack.c.bf16 %v4592_v8, %v4592_v8  ;;  %v3878_v24 = vld [vmem:[#allocation7 + $0x384] ss:$8 sps:$4 sm:$0xff]   ;;  %v3884_v29 = vld [vmem:[#allocation7 + $0x454] ss:$8 sps:$4 sm:$0xff]   ;;  %v932_v8 = vpack.c.bf16 %v4594_v21, %v4594_v21 }
 0x210   : > { %2768 = vmatprep.subr.bf16.mxu0 %v3818_v26  ;;  %2805 = vmatprep.subr.bf16.mxu1 %v3821_v27  ;;  %v4596_v34 = vpop.f32.mrf.mxu1  ;;  %v3876_v27 = vld [vmem:[#allocation7 + $0x380] ss:$8 sps:$4 sm:$0xff]   ;;  %v3899_v21 = vld [vmem:[#allocation7 + $0x554] ss:$8 sps:$4 sm:$0xff]  }
 0x212   : > { %v4598_v35 = vpop.f32.mrf.mxu1 }
 0x213   : > { %2769 = vmatpush1.bf16.msra.mxu0 %v3816_v30  ;;  %2806 = vmatpush1.bf16.msra.mxu1 %v3819_v31  ;;  %v935_v26 = vpack.c.bf16 %v4598_v35, %v4598_v35  ;;  %v3887_v30 = vld [vmem:[#allocation7 + $0x574] ss:$8 sps:$4 sm:$0xff]   ;;  %v3882_v31 = vld [vmem:[#allocation7 + $0x450] ss:$8 sps:$4 sm:$0xff]   ;;  %v3893_v35 = vld [vmem:[#allocation7 + $0x564] ss:$8 sps:$4 sm:$0xff]  }
 0x214   : > { %2770 = vmatprep.subr.bf16.mxu0 %v3824_v32  ;;  %2807 = vmatprep.subr.bf16.mxu1 %v3827_v33  ;;  %v739_v41 = vpop.f32.mrf.mxu1  ;;  %v3885_v32 = vld [vmem:[#allocation7 + $0x570] ss:$8 sps:$4 sm:$0xff]   ;;  %v3890_v33 = vld [vmem:[#allocation7 + $0x444] ss:$8 sps:$4 sm:$0xff]  }
 0x215   : > { %v3894_v41 = vld [vmem:[#allocation7 + $0x430] ss:$8 sps:$4 sm:$0xff]  }
 0x216   : > { %v740_v43 = vpop.f32.mrf.mxu1 }
 0x217   : > { %2771 = vmatpush2.bf16.msra.mxu0 %v3822_v36  ;;  %2808 = vmatpush1.bf16.msra.mxu1 %v3825_v37  ;;  %v937_v36 = vpack.c.bf16 %v4586_v42, %v4586_v42  ;;  %v3888_v37 = vld [vmem:[#allocation7 + $0x440] ss:$8 sps:$4 sm:$0xff]   ;;  %v3897_v43 = vld [vmem:[#allocation7 + $0x550] ss:$8 sps:$4 sm:$0xff]  }
 0x218   : > { %2772 = vmatprep.subr.bf16.mxu0 %v3830_v38  ;;  %2809 = vmatprep.subr.bf16.mxu1 %v3833_v39  ;;  %v4600_v62 = vpop.f32.mrf.mxu1  ;;  %v3891_v38 = vld [vmem:[#allocation7 + $0x560] ss:$8 sps:$4 sm:$0xff]   ;;  %v3896_v39 = vld [vmem:[#allocation7 + $0x434] ss:$8 sps:$4 sm:$0xff]  }
 0x219   : > { %v3900_v42 = vld [vmem:[#allocation7 + $0x420] ss:$8 sps:$4 sm:$0xff]  }
 0x21a   : > { %v4602_v2 = vpop.f32.mrf.mxu1 }
 0x21b   : > { %2773 = vmatpush2.bf16.msra.mxu0 %v3828_v44  ;;  %2810 = vmatpush1.bf16.msra.mxu1 %v3831_v45  ;;  %v3902_v44 = vld [vmem:[#allocation7 + $0x424] ss:$8 sps:$4 sm:$0xff]  }
 0x21c   : > { %2774 = vmatprep.subr.bf16.mxu0 %v3836_v46  ;;  %2811 = vmatprep.subr.bf16.mxu1 %v3839_v47  ;;  %v831_v5 = vpop.f32.mrf.mxu1  ;;  %v3905_v45 = vld [vmem:[#allocation7 + $0x544] ss:$8 sps:$4 sm:$0xff]   ;;  %v3903_v46 = vld [vmem:[#allocation7 + $0x540] ss:$8 sps:$4 sm:$0xff]   ;;  %v3908_v47 = vld [vmem:[#allocation7 + $0x414] ss:$8 sps:$4 sm:$0xff]  }
 0x21d   : > { %v3935_v5 = vld [vmem:[#allocation7 + $0x5f4] ss:$8 sps:$4 sm:$0xff]  }
 0x21e   : > { %v832_v9 = vpop.f32.mrf.mxu1 }
 0x21f   : > { %2775 = vmatpush2.bf16.msra.mxu0 %v3834_v48  ;;  %2812 = vmatpush2.bf16.msra.mxu1 %v3837_v49  ;;  %v3911_v48 = vld [vmem:[#allocation7 + $0x534] ss:$8 sps:$4 sm:$0xff]   ;;  %v3906_v49 = vld [vmem:[#allocation7 + $0x410] ss:$8 sps:$4 sm:$0xff]   ;;  %v3938_v9 = vld [vmem:[#allocation7 + $0x4c4] ss:$8 sps:$4 sm:$0xff]  }
 0x220   : > { %2776 = vmatprep.subr.bf16.mxu0 %v3842_v50  ;;  %2813 = vmatprep.subr.bf16.mxu1 %v3845_v51  ;;  %v4604_v12 = vpop.f32.mrf.mxu1  ;;  %v3909_v50 = vld [vmem:[#allocation7 + $0x530] ss:$8 sps:$4 sm:$0xff]   ;;  %v3914_v51 = vld [vmem:[#allocation7 + $0x404] ss:$8 sps:$4 sm:$0xff]  }
 0x222   : > { %v4606_v15 = vpop.f32.mrf.mxu1 }
 0x223   : > { %2777 = vmatpush2.bf16.msra.mxu0 %v3840_v52  ;;  %2814 = vmatpush2.bf16.msra.mxu1 %v3843_v53  ;;  %v3917_v52 = vld [vmem:[#allocation7 + $0x524] ss:$8 sps:$4 sm:$0xff]   ;;  %v3912_v53 = vld [vmem:[#allocation7 + $0x400] ss:$8 sps:$4 sm:$0xff]  }
 0x224   : > { %2778 = vmatprep.subr.bf16.mxu0 %v3848_v55  ;;  %2815 = vmatprep.subr.bf16.mxu1 %v3851_v56  ;;  %v923_v18 = vpop.f32.mrf.mxu1  ;;  %v3915_v55 = vld [vmem:[#allocation7 + $0x520] ss:$8 sps:$4 sm:$0xff]   ;;  %v3920_v56 = vld [vmem:[#allocation7 + $0x4f4] ss:$8 sps:$4 sm:$0xff]  }
 0x225   : > { %v3945_v18 = vld [vmem:[#allocation7 + $0x5d0] ss:$8 sps:$4 sm:$0xff]  }
 0x226   : > { %v924_v22 = vpop.f32.mrf.mxu1 }
 0x227   : > { %2779 = vmatpush2.bf16.msra.mxu0 %v3846_v58  ;;  %2816 = vmatpush2.bf16.msra.mxu1 %v3849_v59  ;;  %v3923_v58 = vld [vmem:[#allocation7 + $0x514] ss:$8 sps:$4 sm:$0xff]   ;;  %v3918_v59 = vld [vmem:[#allocation7 + $0x4f0] ss:$8 sps:$4 sm:$0xff]   ;;  %v3948_v22 = vld [vmem:[#allocation7 + $0x4a0] ss:$8 sps:$4 sm:$0xff]  }
 0x228   : > { %2780 = vmatprep.subr.bf16.mxu0 %v3854_v60  ;;  %2817 = vmatprep.subr.bf16.mxu1 %v3857_v61  ;;  %v3921_v60 = vld [vmem:[#allocation7 + $0x510] ss:$8 sps:$4 sm:$0xff]   ;;  %v3926_v61 = vld [vmem:[#allocation7 + $0x4e4] ss:$8 sps:$4 sm:$0xff]  }
 0x22b   : > { %2781 = vmatpush2.bf16.msra.mxu0 %v3852_v63  ;;  %2818 = vmatpush2.bf16.msra.mxu1 %v3855_v1  ;;  %v3929_v63 = vld [vmem:[#allocation7 + $0x504] ss:$8 sps:$4 sm:$0xff]   ;;  %v3924_v1 = vld [vmem:[#allocation7 + $0x4e0] ss:$8 sps:$4 sm:$0xff]  }
 0x22c   : > { %2782 = vmatprep.subr.bf16.mxu0 %v3860_v3  ;;  %2819 = vmatprep.subr.bf16.mxu1 %v3863_v4  ;;  %v3927_v3 = vld [vmem:[#allocation7 + $0x500] ss:$8 sps:$4 sm:$0xff]   ;;  %v3932_v4 = vld [vmem:[#allocation7 + $0x4d4] ss:$8 sps:$4 sm:$0xff]  }
 0x22f   : > { %2783 = vmatpush2.bf16.msra.mxu0 %v3858_v6  ;;  %2820 = vmatpush2.bf16.msra.mxu1 %v3861_v7  ;;  %v3930_v6 = vld [vmem:[#allocation7 + $0x4d0] ss:$8 sps:$4 sm:$0xff]  }
 0x230   : > { %2784 = vmatprep.subr.bf16.mxu0 %v3866_v10  ;;  %2821 = vmatprep.subr.bf16.mxu1 %v3869_v11  ;;  %v3933_v7 = vld [vmem:[#allocation7 + $0x5f0] ss:$8 sps:$4 sm:$0xff]   ;;  %v3941_v10 = vld [vmem:[#allocation7 + $0x5e4] ss:$8 sps:$4 sm:$0xff]   ;;  %v3936_v11 = vld [vmem:[#allocation7 + $0x4c0] ss:$8 sps:$4 sm:$0xff]  }
 0x233   : > { %2785 = vmatpush2.bf16.msra.mxu0 %v3864_v13  ;;  %2822 = vmatpush2.bf16.msra.mxu1 %v3867_v14  ;;  %v3939_v13 = vld [vmem:[#allocation7 + $0x5e0] ss:$8 sps:$4 sm:$0xff]   ;;  %v3944_v14 = vld [vmem:[#allocation7 + $0x4b4] ss:$8 sps:$4 sm:$0xff]  }
 0x234   : > { %2823 = vmatprep.subr.bf16.mxu1 %v3872_v16  ;;  %2836 = vmatprep.subr.bf16.mxu0 %v3875_v17  ;;  %v3947_v16 = vld [vmem:[#allocation7 + $0x5d4] ss:$8 sps:$4 sm:$0xff]   ;;  %v3942_v17 = vld [vmem:[#allocation7 + $0x4b0] ss:$8 sps:$4 sm:$0xff]  }
 0x236   : > { %2787 = vmatmul.mubr.bf16.vlgmr.msra.gmra.mxu0 %v930_v23  ;;  %v3951_v23 = vld [vmem:[#allocation7 + $0x5c0] ss:$8 sps:$4 sm:$0xff]  }
 0x237   : > { %2824 = vmatpush2.bf16.msra.mxu1 %v3870_v19  ;;  %2837 = vmatpush1.bf16.msra.mxu0 %v3873_v20  ;;  %v3950_v19 = vld [vmem:[#allocation7 + $0x4a4] ss:$8 sps:$4 sm:$0xff]  }
 0x238   : > { %2825 = vmatprep.subr.bf16.mxu1 %v3878_v24  ;;  %2838 = vmatprep.subr.bf16.mxu0 %v3881_v25  ;;  %v3953_v20 = vld [vmem:[#allocation7 + $0x5c4] ss:$8 sps:$4 sm:$0xff]   ;;  %v3956_v24 = vld [vmem:[#allocation7 + $0x494] ss:$8 sps:$4 sm:$0xff]  }
 0x239   : > { %2868 = vmatprep.mubr.bf16.mxu0 %v935_v26  ;;  %v3959_v25 = vld [vmem:[#allocation7 + $0x5b4] ss:$8 sps:$4 sm:$0xff]   ;;  %v3954_v26 = vld [vmem:[#allocation7 + $0x490] ss:$8 sps:$4 sm:$0xff]  }
 0x23b   : > { %2826 = vmatpush2.bf16.msra.mxu1 %v3876_v27  ;;  %2839 = vmatpush1.bf16.msra.mxu0 %v3879_v28  ;;  %v3957_v27 = vld [vmem:[#allocation7 + $0x5b0] ss:$8 sps:$4 sm:$0xff]   ;;  %v3962_v28 = vld [vmem:[#allocation7 + $0x484] ss:$8 sps:$4 sm:$0xff]  }
 0x23c   : > { %2840 = vmatprep.subr.bf16.mxu0 %v3884_v29  ;;  %2877 = vmatprep.subr.bf16.mxu1 %v3887_v30  ;;  %v3965_v29 = vld [vmem:[#allocation7 + $0x5a4] ss:$8 sps:$4 sm:$0xff]   ;;  %v3960_v30 = vld [vmem:[#allocation7 + $0x480] ss:$8 sps:$4 sm:$0xff]  }
 0x23e   : > { %2828 = vmatmul.mubr.bf16.vlgmr.msra.gmra.mxu1 %v932_v8  ;;  %v3963_v8 = vld [vmem:[#allocation7 + $0x5a0] ss:$8 sps:$4 sm:$0xff]  }
 0x23f   : > { %2841 = vmatpush1.bf16.msra.mxu0 %v3882_v31  ;;  %2878 = vmatpush1.bf16.msra.mxu1 %v3885_v32  ;;  %v3968_v31 = vld [vmem:[#allocation7 + $0x594] ss:$8 sps:$4 sm:$0xff]  }
 0x240   : > { %2842 = vmatprep.subr.bf16.mxu0 %v3890_v33  ;;  %2879 = vmatprep.subr.bf16.mxu1 %v3893_v35  ;;  %v3971_v32 = vld [vmem:[#allocation7 + $0x674] ss:$8 sps:$4 sm:$0xff]   ;;  %v3966_v33 = vld [vmem:[#allocation7 + $0x590] ss:$8 sps:$4 sm:$0xff]  }
 0x241   : > { %2909 = vmatprep.mubr.bf16.mxu1 %v937_v36  ;;  %v3969_v35 = vld [vmem:[#allocation7 + $0x670] ss:$8 sps:$4 sm:$0xff]   ;;  %v934_v36 = vpack.c.bf16 %v4596_v34, %v4596_v34 }
 0x242   : > { %v3978_v34 = vld [vmem:[#allocation7 + $0x650] ss:$8 sps:$4 sm:$0xff]  }
 0x243   : > { %2843 = vmatpush1.bf16.msra.mxu0 %v3888_v37  ;;  %2880 = vmatpush1.bf16.msra.mxu1 %v3891_v38  ;;  %v3974_v37 = vld [vmem:[#allocation7 + $0x584] ss:$8 sps:$4 sm:$0xff]  }
 0x244   : > { %2844 = vmatprep.subr.bf16.mxu0 %v3896_v39  ;;  %2881 = vmatprep.subr.bf16.mxu1 %v3899_v21  ;;  %v3977_v38 = vld [vmem:[#allocation7 + $0x664] ss:$8 sps:$4 sm:$0xff]   ;;  %v939_v39 = vpack.c.bf16 %v4602_v2, %v4602_v2  ;;  %v3972_v21 = vld [vmem:[#allocation7 + $0x580] ss:$8 sps:$4 sm:$0xff]  }
 0x245   : > { %v3986_v2 = vld [vmem:[#allocation7 + $0x644] ss:$8 sps:$4 sm:$0xff]  }
 0x247   : > { %2845 = vmatpush1.bf16.msra.mxu0 %v3894_v41  ;;  %2882 = vmatpush1.bf16.msra.mxu1 %v3897_v43  ;;  %v3975_v41 = vld [vmem:[#allocation7 + $0x660] ss:$8 sps:$4 sm:$0xff]   ;;  %v3980_v43 = vld [vmem:[#allocation7 + $0x654] ss:$8 sps:$4 sm:$0xff]  }
 0x248   : > { %2846 = vmatprep.subr.bf16.mxu0 %v3902_v44  ;;  %2883 = vmatprep.subr.bf16.mxu1 %v3905_v45  ;;  %v3983_v44 = vld [vmem:[#allocation7 + $0x774] ss:$8 sps:$4 sm:$0xff]   ;;  %v3981_v45 = vld [vmem:[#allocation7 + $0x770] ss:$8 sps:$4 sm:$0xff]  }
 0x24b   : > { %2847 = vmatpush1.bf16.msra.mxu0 %v3900_v42  ;;  %2884 = vmatpush1.bf16.msra.mxu1 %v3903_v46  ;;  %v936_v42 = vpack.c.bf16 %v4584_v40, %v4584_v40  ;;  %v3989_v46 = vld [vmem:[#allocation7 + $0x764] ss:$8 sps:$4 sm:$0xff]   ;;  %v3990_v40 = vld [vmem:[#allocation7 + $0x630] ss:$8 sps:$4 sm:$0xff]  }
 0x24c   : > { %2848 = vmatprep.subr.bf16.mxu0 %v3908_v47  ;;  %2885 = vmatprep.subr.bf16.mxu1 %v3911_v48  ;;  %v941_v47 = vpack.c.bf16 %v4590_v57, %v4590_v57  ;;  %v3984_v48 = vld [vmem:[#allocation7 + $0x640] ss:$8 sps:$4 sm:$0xff]  }
 0x24d   : > { %v3041_v57 = vld [vmem:[%s4710_s5] sm:$0xf] }
 0x24e   : > { %3044 = vperm.xlu1 %3683, %v3041_v57  }
 0x24f   : > { %2849 = vmatpush1.bf16.msra.mxu0 %v3906_v49  ;;  %2886 = vmatpush1.bf16.msra.mxu1 %v3909_v50  ;;  %v3987_v49 = vld [vmem:[#allocation7 + $0x760] ss:$8 sps:$4 sm:$0xff]   ;;  %v3992_v50 = vld [vmem:[#allocation7 + $0x634] ss:$8 sps:$4 sm:$0xff]  }
 0x250   : > { %2850 = vmatprep.subr.bf16.mxu0 %v3914_v51  ;;  %2887 = vmatprep.subr.bf16.mxu1 %v3917_v52  ;;  %v3995_v51 = vld [vmem:[#allocation7 + $0x754] ss:$8 sps:$4 sm:$0xff]   ;;  %v3993_v52 = vld [vmem:[#allocation7 + $0x750] ss:$8 sps:$4 sm:$0xff]  }
 0x253   : > { %2851 = vmatpush1.bf16.msra.mxu0 %v3912_v53  ;;  %2888 = vmatpush1.bf16.msra.mxu1 %v3915_v55  ;;  %v3998_v53 = vld [vmem:[#allocation7 + $0x624] ss:$8 sps:$4 sm:$0xff]  }
 0x254   : > { %2852 = vmatprep.subr.bf16.mxu0 %v3920_v56  ;;  %2889 = vmatprep.subr.bf16.mxu1 %v3923_v58  ;;  %v4001_v55 = vld [vmem:[#allocation7 + $0x744] ss:$8 sps:$4 sm:$0xff]   ;;  %v3049_v56 = vld [vmem:[%s4711_s6] sm:$0xf] }
 0x255   : > { %v3996_v58 = vld [vmem:[#allocation7 + $0x620] ss:$8 sps:$4 sm:$0xff]   ;;  %3052 = vperm.xlu1 %3683, %v3049_v56   ;;  %v4079_v56 = vld [vmem:[#allocation7 + $0x844] ss:$8 sps:$4 sm:$0xff]  }
 0x257   : > { %2853 = vmatpush2.bf16.msra.mxu0 %v3918_v59  ;;  %2890 = vmatpush1.bf16.msra.mxu1 %v3921_v60  ;;  %v3999_v59 = vld [vmem:[#allocation7 + $0x740] ss:$8 sps:$4 sm:$0xff]   ;;  %v4004_v60 = vld [vmem:[#allocation7 + $0x614] ss:$8 sps:$4 sm:$0xff]  }
 0x258   : > { %2854 = vmatprep.subr.bf16.mxu0 %v3926_v61  ;;  %2891 = vmatprep.subr.bf16.mxu1 %v3929_v63  ;;  %v4007_v61 = vld [vmem:[#allocation7 + $0x734] ss:$8 sps:$4 sm:$0xff]   ;;  %v4002_v63 = vld [vmem:[#allocation7 + $0x610] ss:$8 sps:$4 sm:$0xff]  }
 0x25b   : > { %2855 = vmatpush2.bf16.msra.mxu0 %v3924_v1  ;;  %2892 = vmatpush1.bf16.msra.mxu1 %v3927_v3  ;;  %v4005_v1 = vld [vmem:[#allocation7 + $0x730] ss:$8 sps:$4 sm:$0xff]   ;;  %v4010_v3 = vld [vmem:[#allocation7 + $0x604] ss:$8 sps:$4 sm:$0xff]  }
 0x25c   : > { %2856 = vmatprep.subr.bf16.mxu0 %v3932_v4  ;;  %2893 = vmatprep.subr.bf16.mxu1 %v3935_v5  ;;  %v4013_v4 = vld [vmem:[#allocation7 + $0x724] ss:$8 sps:$4 sm:$0xff]   ;;  %v4008_v5 = vld [vmem:[#allocation7 + $0x600] ss:$8 sps:$4 sm:$0xff]  }
 0x25f   : > { %2857 = vmatpush2.bf16.msra.mxu0 %v3930_v6  ;;  %2894 = vmatpush2.bf16.msra.mxu1 %v3933_v7  ;;  %v4011_v6 = vld [vmem:[#allocation7 + $0x720] ss:$8 sps:$4 sm:$0xff]   ;;  %v4016_v7 = vld [vmem:[#allocation7 + $0x6f4] ss:$8 sps:$4 sm:$0xff]  }
 0x260   : > { %2858 = vmatprep.subr.bf16.mxu0 %v3938_v9  ;;  %2895 = vmatprep.subr.bf16.mxu1 %v3941_v10  ;;  %v4019_v9 = vld [vmem:[#allocation7 + $0x714] ss:$8 sps:$4 sm:$0xff]   ;;  %v4014_v10 = vld [vmem:[#allocation7 + $0x6f0] ss:$8 sps:$4 sm:$0xff]  }
 0x263   : > { %2859 = vmatpush2.bf16.msra.mxu0 %v3936_v11  ;;  %2896 = vmatpush2.bf16.msra.mxu1 %v3939_v13  ;;  %v4017_v11 = vld [vmem:[#allocation7 + $0x710] ss:$8 sps:$4 sm:$0xff]   ;;  %v4022_v13 = vld [vmem:[#allocation7 + $0x6e4] ss:$8 sps:$4 sm:$0xff]  }
 0x264   : > { %2860 = vmatprep.subr.bf16.mxu0 %v3944_v14  ;;  %2897 = vmatprep.subr.bf16.mxu1 %v3947_v16  ;;  %v4025_v14 = vld [vmem:[#allocation7 + $0x704] ss:$8 sps:$4 sm:$0xff]   ;;  %v4020_v16 = vld [vmem:[#allocation7 + $0x6e0] ss:$8 sps:$4 sm:$0xff]  }
 0x267   : > { %2861 = vmatpush2.bf16.msra.mxu0 %v3942_v17  ;;  %2898 = vmatpush2.bf16.msra.mxu1 %v3945_v18  ;;  %v4023_v17 = vld [vmem:[#allocation7 + $0x700] ss:$8 sps:$4 sm:$0xff]   ;;  %v4028_v18 = vld [vmem:[#allocation7 + $0x6d4] ss:$8 sps:$4 sm:$0xff]  }
 0x268   : > { %2862 = vmatprep.subr.bf16.mxu0 %v3950_v19  ;;  %2899 = vmatprep.subr.bf16.mxu1 %v3953_v20  ;;  %v4031_v19 = vld [vmem:[#allocation7 + $0x7f4] ss:$8 sps:$4 sm:$0xff]   ;;  %v4026_v20 = vld [vmem:[#allocation7 + $0x6d0] ss:$8 sps:$4 sm:$0xff]  }
 0x26b   : > { %2863 = vmatpush2.bf16.msra.mxu0 %v3948_v22  ;;  %2900 = vmatpush2.bf16.msra.mxu1 %v3951_v23  ;;  %v4029_v22 = vld [vmem:[#allocation7 + $0x7f0] ss:$8 sps:$4 sm:$0xff]   ;;  %v4034_v23 = vld [vmem:[#allocation7 + $0x6c4] ss:$8 sps:$4 sm:$0xff]  }
 0x26c   : > { %2864 = vmatprep.subr.bf16.mxu0 %v3956_v24  ;;  %2901 = vmatprep.subr.bf16.mxu1 %v3959_v25  ;;  %v4037_v24 = vld [vmem:[#allocation7 + $0x7e4] ss:$8 sps:$4 sm:$0xff]   ;;  %v4032_v25 = vld [vmem:[#allocation7 + $0x6c0] ss:$8 sps:$4 sm:$0xff]  }
 0x26f   : > { %2865 = vmatpush2.bf16.msra.mxu0 %v3954_v26  ;;  %2902 = vmatpush2.bf16.msra.mxu1 %v3957_v27  ;;  %v4035_v26 = vld [vmem:[#allocation7 + $0x7e0] ss:$8 sps:$4 sm:$0xff]   ;;  %v4040_v27 = vld [vmem:[#allocation7 + $0x6b4] ss:$8 sps:$4 sm:$0xff]  }
 0x270   : > { %2866 = vmatprep.subr.bf16.mxu0 %v3962_v28  ;;  %2903 = vmatprep.subr.bf16.mxu1 %v3965_v29  ;;  %v4043_v28 = vld [vmem:[#allocation7 + $0x7d4] ss:$8 sps:$4 sm:$0xff]   ;;  %v4038_v29 = vld [vmem:[#allocation7 + $0x6b0] ss:$8 sps:$4 sm:$0xff]  }
 0x273   : > { %2867 = vmatpush2.bf16.msra.mxu0 %v3960_v30  ;;  %2904 = vmatpush2.bf16.msra.mxu1 %v3963_v8  ;;  %v4041_v30 = vld [vmem:[#allocation7 + $0x7d0] ss:$8 sps:$4 sm:$0xff]   ;;  %v4046_v8 = vld [vmem:[#allocation7 + $0x6a4] ss:$8 sps:$4 sm:$0xff]  }
 0x274   : > { %2905 = vmatprep.subr.bf16.mxu1 %v3968_v31  ;;  %2918 = vmatprep.subr.bf16.mxu0 %v3971_v32  ;;  %v4049_v31 = vld [vmem:[#allocation7 + $0x7c4] ss:$8 sps:$4 sm:$0xff]   ;;  %v4044_v32 = vld [vmem:[#allocation7 + $0x6a0] ss:$8 sps:$4 sm:$0xff]  }
 0x276   : > { %2869 = vmatmul.mubr.bf16.vlgmr.msra.gmra.mxu0 %v934_v36  ;;  %v4055_v36 = vld [vmem:[#allocation7 + $0x7b4] ss:$8 sps:$4 sm:$0xff]  }
 0x277   : > { %2906 = vmatpush2.bf16.msra.mxu1 %v3966_v33  ;;  %2919 = vmatpush1.bf16.msra.mxu0 %v3969_v35  ;;  %v4047_v33 = vld [vmem:[#allocation7 + $0x7c0] ss:$8 sps:$4 sm:$0xff]   ;;  %v4052_v35 = vld [vmem:[#allocation7 + $0x694] ss:$8 sps:$4 sm:$0xff]  }
 0x278   : > { %2907 = vmatprep.subr.bf16.mxu1 %v3974_v37  ;;  %2920 = vmatprep.subr.bf16.mxu0 %v3977_v38  ;;  %v4050_v37 = vld [vmem:[#allocation7 + $0x690] ss:$8 sps:$4 sm:$0xff]  }
 0x279   : > { %2950 = vmatprep.mubr.bf16.mxu0 %v939_v39  ;;  %v4053_v38 = vld [vmem:[#allocation7 + $0x7b0] ss:$8 sps:$4 sm:$0xff]   ;;  %v4058_v39 = vld [vmem:[#allocation7 + $0x684] ss:$8 sps:$4 sm:$0xff]  }
 0x27b   : > { %2908 = vmatpush2.bf16.msra.mxu1 %v3972_v21  ;;  %2921 = vmatpush1.bf16.msra.mxu0 %v3975_v41  ;;  %v4061_v21 = vld [vmem:[#allocation7 + $0x7a4] ss:$8 sps:$4 sm:$0xff]   ;;  %v4056_v41 = vld [vmem:[#allocation7 + $0x680] ss:$8 sps:$4 sm:$0xff]  }
 0x27c   : > { %2922 = vmatprep.subr.bf16.mxu0 %v3980_v43  ;;  %2959 = vmatprep.subr.bf16.mxu1 %v3983_v44  ;;  %v4059_v43 = vld [vmem:[#allocation7 + $0x7a0] ss:$8 sps:$4 sm:$0xff]   ;;  %v4064_v44 = vld [vmem:[#allocation7 + $0x794] ss:$8 sps:$4 sm:$0xff]  }
 0x27e   : > { %2910 = vmatmul.mubr.bf16.vlgmr.msra.gmra.mxu1 %v936_v42  ;;  %v4065_v42 = vld [vmem:[#allocation7 + $0x870] ss:$8 sps:$4 sm:$0xff]  }
 0x27f   : > { %2923 = vmatpush1.bf16.msra.mxu0 %v3978_v34  ;;  %2960 = vmatpush1.bf16.msra.mxu1 %v3981_v45  ;;  %v4067_v34 = vld [vmem:[#allocation7 + $0x874] ss:$8 sps:$4 sm:$0xff]   ;;  %v4062_v45 = vld [vmem:[#allocation7 + $0x790] ss:$8 sps:$4 sm:$0xff]  }
 0x280   : > { %2991 = vmatprep.mubr.bf16.mxu1 %v941_v47  ;;  %2924 = vmatprep.subr.bf16.mxu0 %v3986_v2  ;;  %v938_v2 = vpack.c.bf16 %v4600_v62, %v4600_v62  ;;  %v4070_v47 = vld [vmem:[#allocation7 + $0x784] ss:$8 sps:$4 sm:$0xff]  }
 0x281   : > { %2961 = vmatprep.subr.bf16.mxu1 %v3989_v46  ;;  %v943_v46 = vpack.c.bf16 %v4606_v15, %v4606_v15  ;;  %v3121_v62 = vld [vmem:[%s4713_s8 + $0x8] sm:$0xff] }
 0x282   : > { %3129 = vperm.xlu1 %3683, %v3121_v62  }
 0x283   : > { %2925 = vmatpush1.bf16.msra.mxu0 %v3984_v48  ;;  %2962 = vmatpush1.bf16.msra.mxu1 %v3987_v49  ;;  %v4073_v48 = vld [vmem:[#allocation7 + $0x864] ss:$8 sps:$4 sm:$0xff]  }
 0x284   : > { %2926 = vmatprep.subr.bf16.mxu0 %v3992_v50  ;;  %2963 = vmatprep.subr.bf16.mxu1 %v3995_v51  ;;  %v4068_v50 = vld [vmem:[#allocation7 + $0x780] ss:$8 sps:$4 sm:$0xff]  }
 0x285   : > { %v4071_v51 = vld [vmem:[#allocation7 + $0x860] ss:$8 sps:$4 sm:$0xff]  }
 0x287   : > { %2927 = vmatpush1.bf16.msra.mxu0 %v3990_v40  ;;  %2964 = vmatpush1.bf16.msra.mxu1 %v3993_v52  ;;  %v4076_v52 = vld [vmem:[#allocation7 + $0x854] ss:$8 sps:$4 sm:$0xff]  }
 0x288   : > { %2928 = vmatprep.subr.bf16.mxu0 %v3998_v53  ;;  %2965 = vmatprep.subr.bf16.mxu1 %v4001_v55  ;;  %v4074_v53 = vld [vmem:[#allocation7 + $0x850] ss:$8 sps:$4 sm:$0xff]   ;;  %v940_v55 = vpack.c.bf16 %v4588_v54, %v4588_v54 }
 0x28b   : > { %2929 = vmatpush1.bf16.msra.mxu0 %v3996_v58  ;;  %2966 = vmatpush1.bf16.msra.mxu1 %v3999_v59  ;;  %v3137_v58 = vld [vmem:[%s4714_s9 + $0x8] sm:$0xff] }
 0x28c   : > { %2930 = vmatprep.subr.bf16.mxu0 %v4004_v60  ;;  %2967 = vmatprep.subr.bf16.mxu1 %v4007_v61  ;;  %v4077_v61 = vld [vmem:[#allocation7 + $0x840] ss:$8 sps:$4 sm:$0xff]  }
 0x28d   : > { %3145 = vperm.xlu1 %3683, %v3137_v58  }
 0x28f   : > { %2931 = vmatpush1.bf16.msra.mxu0 %v4002_v63  ;;  %2968 = vmatpush1.bf16.msra.mxu1 %v4005_v1  ;;  %v4082_v1 = vld [vmem:[#allocation7 + $0x834] ss:$8 sps:$4 sm:$0xff]  }
 0x290   : > { %2932 = vmatprep.subr.bf16.mxu0 %v4010_v3  ;;  %2969 = vmatprep.subr.bf16.mxu1 %v4013_v4  ;;  %v4080_v4 = vld [vmem:[#allocation7 + $0x830] ss:$8 sps:$4 sm:$0xff]  }
 0x293   : > { %2933 = vmatpush1.bf16.msra.mxu0 %v4008_v5  ;;  %2970 = vmatpush1.bf16.msra.mxu1 %v4011_v6  ;;  %v4085_v5 = vld [vmem:[#allocation7 + $0x824] ss:$8 sps:$4 sm:$0xff]  }
 0x294   : > { %2934 = vmatprep.subr.bf16.mxu0 %v4016_v7  ;;  %2971 = vmatprep.subr.bf16.mxu1 %v4019_v9  ;;  %v4083_v7 = vld [vmem:[#allocation7 + $0x820] ss:$8 sps:$4 sm:$0xff]   ;;  %v4088_v9 = vld [vmem:[#allocation7 + $0x814] ss:$8 sps:$4 sm:$0xff]  }
 0x297   : > { %2935 = vmatpush2.bf16.msra.mxu0 %v4014_v10  ;;  %2972 = vmatpush1.bf16.msra.mxu1 %v4017_v11  ;;  %v4086_v10 = vld [vmem:[#allocation7 + $0x810] ss:$8 sps:$4 sm:$0xff]   ;;  %v4091_v11 = vld [vmem:[#allocation7 + $0x804] ss:$8 sps:$4 sm:$0xff]  }
 0x298   : > { %2936 = vmatprep.subr.bf16.mxu0 %v4022_v13  ;;  %2973 = vmatprep.subr.bf16.mxu1 %v4025_v14  ;;  %v4094_v13 = vld [vmem:[#allocation7 + $0x8f4] ss:$8 sps:$4 sm:$0xff]   ;;  %v4092_v14 = vld [vmem:[#allocation7 + $0x8f0] ss:$8 sps:$4 sm:$0xff]  }
 0x29b   : > { %2937 = vmatpush2.bf16.msra.mxu0 %v4020_v16  ;;  %2974 = vmatpush1.bf16.msra.mxu1 %v4023_v17  ;;  %v4097_v16 = vld [vmem:[#allocation7 + $0x8e4] ss:$8 sps:$4 sm:$0xff]   ;;  %v4095_v17 = vld [vmem:[#allocation7 + $0x8e0] ss:$8 sps:$4 sm:$0xff]  }
 0x29c   : > { %2938 = vmatprep.subr.bf16.mxu0 %v4028_v18  ;;  %2975 = vmatprep.subr.bf16.mxu1 %v4031_v19  ;;  %v4100_v18 = vld [vmem:[#allocation7 + $0x8d4] ss:$8 sps:$4 sm:$0xff]   ;;  %v4098_v19 = vld [vmem:[#allocation7 + $0x8d0] ss:$8 sps:$4 sm:$0xff]  }
 0x29f   : > { %2939 = vmatpush2.bf16.msra.mxu0 %v4026_v20  ;;  %2976 = vmatpush2.bf16.msra.mxu1 %v4029_v22  ;;  %v4103_v20 = vld [vmem:[#allocation7 + $0x8c4] ss:$8 sps:$4 sm:$0xff]   ;;  %v4101_v22 = vld [vmem:[#allocation7 + $0x8c0] ss:$8 sps:$4 sm:$0xff]  }
 0x2a0   : > { %2940 = vmatprep.subr.bf16.mxu0 %v4034_v23  ;;  %2977 = vmatprep.subr.bf16.mxu1 %v4037_v24  ;;  %v4106_v23 = vld [vmem:[#allocation7 + $0x8b4] ss:$8 sps:$4 sm:$0xff]   ;;  %v4104_v24 = vld [vmem:[#allocation7 + $0x8b0] ss:$8 sps:$4 sm:$0xff]  }
 0x2a3   : > { %2941 = vmatpush2.bf16.msra.mxu0 %v4032_v25  ;;  %2978 = vmatpush2.bf16.msra.mxu1 %v4035_v26  ;;  %v4109_v25 = vld [vmem:[#allocation7 + $0x8a4] ss:$8 sps:$4 sm:$0xff]   ;;  %v4107_v26 = vld [vmem:[#allocation7 + $0x8a0] ss:$8 sps:$4 sm:$0xff]  }
 0x2a4   : > { %2942 = vmatprep.subr.bf16.mxu0 %v4040_v27  ;;  %2979 = vmatprep.subr.bf16.mxu1 %v4043_v28  ;;  %v4112_v27 = vld [vmem:[#allocation7 + $0x894] ss:$8 sps:$4 sm:$0xff]   ;;  %v4110_v28 = vld [vmem:[#allocation7 + $0x890] ss:$8 sps:$4 sm:$0xff]  }
 0x2a7   : > { %2943 = vmatpush2.bf16.msra.mxu0 %v4038_v29  ;;  %2980 = vmatpush2.bf16.msra.mxu1 %v4041_v30  ;;  %v4115_v29 = vld [vmem:[#allocation7 + $0x884] ss:$8 sps:$4 sm:$0xff]   ;;  %v4113_v30 = vld [vmem:[#allocation7 + $0x880] ss:$8 sps:$4 sm:$0xff]  }
 0x2a8   : > { %2944 = vmatprep.subr.bf16.mxu0 %v4046_v8  ;;  %2981 = vmatprep.subr.bf16.mxu1 %v4049_v31  ;;  %v942_v8 = vpack.c.bf16 %v4604_v12, %v4604_v12 }
 0x2ab   : > { %2945 = vmatpush2.bf16.msra.mxu0 %v4044_v32  ;;  %2982 = vmatpush2.bf16.msra.mxu1 %v4047_v33 }
 0x2ac   : > { %2946 = vmatprep.subr.bf16.mxu0 %v4052_v35  ;;  %2983 = vmatprep.subr.bf16.mxu1 %v4055_v36 }
 0x2af   : > { %2947 = vmatpush2.bf16.msra.mxu0 %v4050_v37  ;;  %2984 = vmatpush2.bf16.msra.mxu1 %v4053_v38 }
 0x2b0   : > { %2948 = vmatprep.subr.bf16.mxu0 %v4058_v39  ;;  %2985 = vmatprep.subr.bf16.mxu1 %v4061_v21 }
 0x2b3   : > { %2949 = vmatpush2.bf16.msra.mxu0 %v4056_v41  ;;  %2986 = vmatpush2.bf16.msra.mxu1 %v4059_v43 }
 0x2b4   : > { %2987 = vmatprep.subr.bf16.mxu1 %v4064_v44  ;;  %3000 = vmatprep.subr.bf16.mxu0 %v4067_v34 }
 0x2b6   : > { %2951 = vmatmul.mubr.bf16.vlgmr.msra.gmra.mxu0 %v938_v2  ;;  %v2706_v49 = vpop.f32.mrf.mxu0 }
 0x2b7   : > { %2988 = vmatpush2.bf16.msra.mxu1 %v4062_v45  ;;  %3001 = vmatpush1.bf16.msra.mxu0 %v4065_v42 }
 0x2b8   : > { %3032 = vmatprep.mubr.bf16.mxu0 %v943_v46  ;;  %v2708_v40 = vpop.f32.mrf.mxu0  ;;  %2989 = vmatprep.subr.bf16.mxu1 %v4070_v47 }
 0x2b9   : > { %3002 = vmatprep.subr.bf16.mxu0 %v4073_v48 }
 0x2ba   : > { %v2710_v15 = vpop.f32.mrf.mxu0 }
 0x2bb   : > { %2990 = vmatpush2.bf16.msra.mxu1 %v4068_v50  ;;  %3003 = vmatpush1.bf16.msra.mxu0 %v4071_v51 }
 0x2bc   : > { %v2711_v57 = vpop.f32.mrf.mxu0  ;;  %3004 = vmatprep.subr.bf16.mxu0 %v4076_v52 }
 0x2be   : > { %2992 = vmatmul.mubr.bf16.vlgmr.msra.gmra.mxu1 %v940_v55  ;;  %v2747_v59 = vpop.f32.mrf.mxu1 }
 0x2bf   : > { %v2748_v60 = vadd.f32 %v2747_v59, %v2706_v49  ;;  %3005 = vmatpush1.bf16.msra.mxu0 %v4074_v53  ;;  %3109 = vmatprep.mubr.bf16.mxu1 %v4278_v0  ;;  %v4089_v0 = vld [vmem:[#allocation7 + $0x800] ss:$8 sps:$4 sm:$0xff]  }
 0x2c0   : > { %v2749_v63 = vpop.f32.mrf.mxu1  ;;  %3006 = vmatprep.subr.bf16.mxu0 %v4079_v56 }
 0x2c1   : > { %v2750_v3 = vadd.f32 %v2749_v63, %v2708_v40 }
 0x2c2   : > { %v2751_v54 = vpop.f32.mrf.mxu1 }
 0x2c3   : > { %3007 = vmatpush1.bf16.msra.mxu0 %v4077_v61 }
 0x2c4   : > { %3008 = vmatprep.subr.bf16.mxu0 %v4082_v1  ;;  %v2752_v6 = vpop.f32.mrf.mxu1 }
 0x2c7   : > { %3009 = vmatpush1.bf16.msra.mxu0 %v4080_v4 }
 0x2c8   : > { %3010 = vmatprep.subr.bf16.mxu0 %v4085_v5 }
 0x2cb   : > { %3011 = vmatpush1.bf16.msra.mxu0 %v4083_v7 }
 0x2cc   : > { %3012 = vmatprep.subr.bf16.mxu0 %v4088_v9 }
 0x2cf   : > { %3013 = vmatpush1.bf16.msra.mxu0 %v4086_v10 }
 0x2d0   : > { %3014 = vmatprep.subr.bf16.mxu0 %v4091_v11 }
 0x2d3   : > { %3015 = vmatpush1.bf16.msra.mxu0 %v4089_v0 }
 0x2d4   : > { %3016 = vmatprep.subr.bf16.mxu0 %v4094_v13 }
 0x2d7   : > { %3017 = vmatpush2.bf16.msra.mxu0 %v4092_v14 }
 0x2d8   : > { %3018 = vmatprep.subr.bf16.mxu0 %v4097_v16 }
 0x2db   : > { %3019 = vmatpush2.bf16.msra.mxu0 %v4095_v17 }
 0x2dc   : > { %3020 = vmatprep.subr.bf16.mxu0 %v4100_v18 }
 0x2df   : > { %3021 = vmatpush2.bf16.msra.mxu0 %v4098_v19 }
 0x2e0   : > { %3022 = vmatprep.subr.bf16.mxu0 %v4103_v20  ;;  %v4116_v20 = vld [vmem:[%s4712_s7] sm:$0xff]  }
 0x2e3   : > { %3023 = vmatpush2.bf16.msra.mxu0 %v4101_v22  ;;  %v3125_v22 = vpop.permute.xlu0 %3124 }
 0x2e4   : > { %3024 = vmatprep.subr.bf16.mxu0 %v4106_v23 }
 0x2e7   : > { %3025 = vmatpush2.bf16.msra.mxu0 %v4104_v24 }
 0x2e8   : > { %3026 = vmatprep.subr.bf16.mxu0 %v4109_v25 }
 0x2eb   : > { %3027 = vmatpush2.bf16.msra.mxu0 %v4107_v26  ;;  %v3141_v26 = vpop.permute.xlu0 %3140 }
 0x2ec   : > { %3028 = vmatprep.subr.bf16.mxu0 %v4112_v27 }
 0x2ef   : > { %3029 = vmatpush2.bf16.msra.mxu0 %v4110_v28 }
 0x2f0   : > { %3030 = vmatprep.subr.bf16.mxu0 %v4115_v29 }
 0x2f3   : > { %3031 = vmatpush2.bf16.msra.mxu0 %v4113_v30 }
 0x2f6   : > { %v2788_v31 = vpop.f32.mrf.mxu0  ;;  %3033 = vmatmul.mubr.bf16.vlgmr.msra.gmra.mxu0 %v942_v8  ;;  %v4117_v8 = vld [vmem:[%s4478_s19] sm:$0xff] }
 0x2f7   : > { %v2789_v32 = vadd.f32 %v2788_v31, %v2748_v60  ;;  %v3045_v60 = vpop.permute.xlu1 %3044 }
 0x2f8   : > { %v2790_v33 = vpop.f32.mrf.mxu0 }
 0x2f9   : > { %v2791_v35 = vadd.f32 %v2790_v33, %v2750_v3 }
 0x2fa   : > { %v2792_v36 = vpop.f32.mrf.mxu0 }
 0x2fb   : > { %v3053_v7 = vpop.permute.xlu1 %3052 }
 0x2fc   : > { %v2793_v37 = vpop.f32.mrf.mxu0 }
 0x2fe   : > { %v2829_v38 = vpop.f32.mrf.mxu1 }
 0x2ff   : > { %v2830_v39 = vadd.f32 %v2829_v38, %v2789_v32  ;;  %v3130_v23 = vpop.permute.xlu1 %3129  ;;  %v4118_v38 = vld [vmem:[%s4478_s19 + $0x8] sm:$0xff] }
 0x300   : > { %v2831_v21 = vpop.f32.mrf.mxu1 }
 0x301   : > { %v2832_v41 = vadd.f32 %v2831_v21, %v2791_v35 }
 0x302   : > { %v2833_v43 = vpop.f32.mrf.mxu1 }
 0x304   : > { %v2834_v44 = vpop.f32.mrf.mxu1 }
 0x305   : > { %v4119_v44 = vld [vmem:[%s4478_s19 + $0x10] sm:$0xff] }
 0x308   : > { %v3146_v35 = vpop.permute.xlu1 %3145 }
 0x336   : > { %v2870_v34 = vpop.f32.mrf.mxu0 }
 0x337   : > { %v2871_v45 = vadd.f32 %v2870_v34, %v2830_v39 }
 0x338   : > { %v2872_v42 = vpop.f32.mrf.mxu0 }
 0x339   : > { %v2873_v2 = vadd.f32 %v2872_v42, %v2832_v41 }
 0x33a   : > { %v2874_v46 = vpop.f32.mrf.mxu0 }
 0x33c   : > { %v2875_v47 = vpop.f32.mrf.mxu0 }
 0x33e   : > { %v2911_v12 = vpop.f32.mrf.mxu1 }
 0x33f   : > { %v2912_v48 = vadd.f32 %v2911_v12, %v2871_v45 }
 0x340   : > { %v2913_v49 = vpop.f32.mrf.mxu1 }
 0x341   : > { %v2914_v50 = vadd.f32 %v2913_v49, %v2873_v2  ;;  %v4120_v2 = vld [vmem:[%s4478_s19 + $0x18] sm:$0xff] }
 0x342   : > { %v2915_v51 = vpop.f32.mrf.mxu1 }
 0x344   : > { %v2916_v40 = vpop.f32.mrf.mxu1 }
 0x376   : > { %v2952_v52 = vpop.f32.mrf.mxu0 }
 0x377   : > { %v2953_v59 = vadd.f32 %v2952_v52, %v2912_v48 }
 0x378   : > { %v2954_v62 = vpop.f32.mrf.mxu0 }
 0x379   : > { %v2955_v61 = vadd.f32 %v2954_v62, %v2914_v50 }
 0x37a   : > { %v2956_v15 = vpop.f32.mrf.mxu0 }
 0x37c   : > { %v2957_v53 = vpop.f32.mrf.mxu0 }
 0x37e   : > { %v2993_v55 = vpop.f32.mrf.mxu1 }
 0x37f   : > { %v2994_v63 = vadd.f32 %v2993_v55, %v2953_v59 }
 0x380   : > { %v2995_v57 = vpop.f32.mrf.mxu1 }
 0x381   : > { %v2996_v3 = vadd.f32 %v2995_v57, %v2955_v61 }
 0x382   : > { %v2997_v56 = vpop.f32.mrf.mxu1 }
 0x384   : > { %v2998_v58 = vpop.f32.mrf.mxu1 }
 0x3b6   : > { %v3034_v1 = vpop.f32.mrf.mxu0 }
 0x3b7   : > { %v3035_v54 = vadd.f32 %v3034_v1, %v2994_v63 }
 0x3b8   : > { %v3036_v4 = vpop.f32.mrf.mxu0 }
 0x3b9   : > { %v3047_v5 = vmul.f32 %v3045_v60, %v3035_v54  ;;  %v3037_v6 = vadd.f32 %v3036_v4, %v2996_v3 }
 0x3ba   : > { %v3038_v9 = vpop.f32.mrf.mxu0 }
 0x3bb   : > { %v3055_v10 = vadd.f32 %v3053_v7, %v3047_v5  ;;  %v3048_v11 = vmul.f32 %v3045_v60, %v3037_v6 }
 0x3bc   : > { %v3039_v0 = vpop.f32.mrf.mxu0 }
 0x3bd   : > { %v3057_v13 = vmax.f32 %v3055_v10, 0.0  ;;  %v3056_v14 = vadd.f32 %v3053_v7, %v3048_v11 }
 0x3bf   : > { %v3058_v16 = vmax.f32 %v3056_v14, 0.0  ;;  %v3061_v17 = vpack.c.bf16 %v3057_v13, %v3057_v13 }
 0x3c1   : > { %v3062_v18 = vpack.c.bf16 %v3058_v16, %v3058_v16  ;;  %v3072_v19 = vsel %vm510_vm1, %v3061_v17, 0 }
 0x3c3   : > { %3599 = vmatprep.subr.msk.bf16.mxu1 %vm510_vm1, %v3062_v18 }
 0x3c4   : > { %3092 = vmatpush1.bf16.msra.mxu1 %v3072_v19 }
 0x3c7   : > { %3600 = vmatmul.mubr.msk.bf16.vlgmr.msra.gmra.mxu1 %vm506_vm2, %v4116_v20 }
 0x487   : > { %v3111_v24 = vpop.f32.mrf.mxu1 }
 0x488   : > { %v3132_v25 = vmul.f32 %v3125_v22, %v3111_v24 }
 0x489   : > { %v3113_v27 = vpop.f32.mrf.mxu1 }
 0x48a   : > { %v3148_v28 = vadd.f32 %v3141_v26, %v3132_v25  ;;  %v3133_v29 = vmul.f32 %v3125_v22, %v3113_v27 }
 0x48b   : > { %v3115_v30 = vpop.f32.mrf.mxu1 }
 0x48c   : > { %v3152_v31 = vadd.f32 %v4117_v8, %v3148_v28  ;;  %v3149_v32 = vadd.f32 %v3141_v26, %v3133_v29  ;;  %v3134_v33 = vmul.f32 %v3130_v23, %v3115_v30 }
 0x48d   : > { %v3117_v36 = vpop.f32.mrf.mxu1 }
 0x48e   : > { %v3156_v37 = vmax.f32 %v3152_v31, 0.0  ;;  %v3153_v39 = vadd.f32 %v4118_v38, %v3149_v32  ;;  %v3150_v21 = vadd.f32 %v3146_v35, %v3134_v33  ;;  %v3135_v41 = vmul.f32 %v3130_v23, %v3117_v36 }
 0x490   : > { %3160 = vst [vmem:[%s431_s23] sm:$0xff] %v3156_v37  ;;  %v3157_v43 = vmax.f32 %v3153_v39, 0.0  ;;  %v3154_v34 = vadd.f32 %v4119_v44, %v3150_v21  ;;  %v3151_v45 = vadd.f32 %v3146_v35, %v3135_v41 }
 0x492   : > { %3161 = vst [vmem:[%s431_s23 + $0x8] sm:$0xff] %v3157_v43  ;;  %v3158_v42 = vmax.f32 %v3154_v34, 0.0  ;;  %v3155_v46 = vadd.f32 %v4120_v2, %v3151_v45 }
 0x494   : > { %3162 = vst [vmem:[%s431_s23 + $0x10] sm:$0xff] %v3158_v42  ;;  %v3159_v47 = vmax.f32 %v3155_v46, 0.0 }
 0x496   : > { %3163 = vst [vmem:[%s431_s23 + $0x18] sm:$0xff] %v3159_v47 }
 0x497   : > { %4214 = shalt.err (!%p4211_p12)
}
 0x498   : > { %s4215_s19 = scalar_lea.hbm %s4663_s14, 512  ;;  %s4219_s12 = scalar_lea.hbm %s4750_s13, 2048 }
 0x499   : > { %p4216_p6 = scmp.ne.s32.totalorder %s4663_s14, %s4215_s19  ;;  %p4220_p13 = scmp.lt.s32.totalorder %s4663_s14, %s4750_s13 }
 0x49a   : > { %p4221_p3 = scmp.lt.s32.totalorder %s4219_s12, %s4215_s19 }
 0x49b   : > { %p4217_p0 = pnand %p4216_p6, %p4751_p1 }
 0x49c   : > { %p4222_p7 = por %p4221_p3, %p4220_p13 }
 0x49d   : > { %p4218_p11 = pneg %p4217_p0 }
 0x49f   : > { %p4223_p10 = pnand %p4222_p7, %p4218_p11 }
 0x4a1   : > { %4226 = shalt.err (!%p4223_p10)
}
 0x4a2   : > { %s4280_s22 = smov 256   ;;  %s4281_s27 = smov 16  }
 0x4a3   : > { %3618 = dma.vmem_to_hbm [thread:$0]  (%p4751_p1), %s4657_s30, 512, %s4663_s14, %s3165_s26, %s4280_s22, %s4280_s22, %s4281_s27  }
 0x4a4 PF: > { %s4752_s24 = sld [smem:[#allocation12_spill]]  ;;  %p3640_p5 = scmp.ge.s32.totalorder %s4269_s20, 2 }
 0x4a5   : > { %s4753_s25 = sld [smem:[#allocation17_spill]] }
 0x4aa   : > { %s3193_s21 = sand.u32 1, %s4752_s24  }
 0x4ab   : > { %p4754_p2 = scmp.ne.s32.totalorder %s4753_s25, 0  ;;  %s3194_s11 = scalar_lea.sflag [#allocation4], %s3193_s21 }
 0x4ad   : > { %p3632_p8 = pnand %p3640_p5, %p4754_p2 }
 0x4af   : > { %p3633_p9 = pneg %p3632_p8 }
 0x4b1   : > { %4252 = dma.done.wait (%p3633_p9), %s3194_s11, 512  }
 0x4b2   : > { %4254 = vsyncadd (%p3633_p9), %s3194_s11, 4294966784  ;;  %s4755_s20 = sld [smem:[#allocation14_spill]]  ;;  %s4758_s17 = smov %s4261_s18 }
 0x4b3   : > { %s4756_s19 = sld [smem:[#allocation13_spill]] }
 0x4b4   : > { %s4757_s28 = sld [smem:[#allocation15_spill]] }
 0x4b8   : > { %p25_p4 = scmp.ge.s32.totalorder %s4755_s20, 6  }
 0x4b9   : > { %s4759_s18 = smov %s4756_s19 }
 0x4ba   : > { %s4760_s19 = smov %s4757_s28  ;;  %27 = sbr.rel (!%p25_p4) target bundleno = 9 (0x9), region = 125 }
 0x4bf   :  { %3199 = vsyncpa [#allocation3], 1 }
 0x4c0   :  { %3201 = vsyncpa [#allocation3 + $0x1], 1 }
 0x4c1   :  { %3202 = vsyncpa [#allocation6], 1 }
 0x4c2   :  { %3203 = vsyncpa [#allocation4], 1 }
 0x4c3   :  { %3205 = vsyncpa [#allocation4 + $0x1], 1 }

</bundles_post_ra>
